<compile_context>
chip_gen: v7x
topology: tpu7x:2x2x1
jax: 0.10.0
libtpu: 0.0.40
codegen_flags: <defaults>
</compile_context>

<pallas_src>
import functools

import jax
import jax.numpy as jnp
import numpy as np
from jax import lax
from jax.experimental import pallas as pl
from jax.experimental.pallas import tpu as pltpu


def encoder_lstm_kernel(x_ref, lens_ref, wih_ref, whh_ref, b_ref,
                        hlast_ref, xg_ref):
    """Encoder LSTM over time for one batch tile; writes h at t = len-1 per row."""
    T, Bt, E = x_ref.shape
    H = whh_ref.shape[0]

    # Hoisted input projection: one (T*Bt, E) @ (E, 4H) MXU matmul + one bias
    # add, stored time-major so the per-step fetch is a leading-axis offset.
    x_flat = x_ref[...].reshape(T * Bt, E)
    xg_ref[...] = (jnp.dot(x_flat, wih_ref[...],
                           preferred_element_type=jnp.float32)
                   + b_ref[...]).reshape(T, Bt, 4 * H)

    lm1 = lens_ref[...] - 1                       # (Bt, 1), hoisted out of loop

    h0 = jnp.zeros((Bt, H), jnp.float32)
    c0 = jnp.zeros((Bt, H), jnp.float32)

    def step(t, carry):
        h, c, h_last = carry
        # Only the recurrent matmul remains inside the serial loop.
        gates = xg_ref[t] + jnp.dot(h, whh_ref[...],
                                    preferred_element_type=jnp.float32)
        i_g = jax.nn.sigmoid(gates[:, 0 * H:1 * H])   # lane-aligned 128-wide
        f_g = jax.nn.sigmoid(gates[:, 1 * H:2 * H])
        g_g = jnp.tanh(gates[:, 2 * H:3 * H])
        o_g = jax.nn.sigmoid(gates[:, 3 * H:4 * H])
        c_new = f_g * c + i_g * g_g
        h_new = o_g * jnp.tanh(c_new)
        h_last_new = jnp.where(lm1 == t, h_new, h_last)
        return h_new, c_new, h_last_new

    # T is static & small: fully unroll so adjacent steps interleave in bundles.
    _, _, h_final = lax.fori_loop(0, T, step, (h0, c0, h0), unroll=True)
    hlast_ref[...] = h_final


def decoder_fc_kernel(henc_ref, wih_ref, whh_ref, b_ref, wfc_ref, bfc_ref,
                      out_ref, *, seq_len):
    """Decoder LSTM over the (batch=1, seq=B) sequence of encoder hn + final FC."""
    _, H = henc_ref.shape

    # Hoisted decoder input projection for all "tokens" (= encoder final hiddens).
    xg = (jnp.dot(henc_ref[...], wih_ref[...],
                  preferred_element_type=jnp.float32) + b_ref[...])  # (Bpad, 4H)

    h = jnp.zeros((1, H), jnp.float32)
    c = jnp.zeros((1, H), jnp.float32)
    for b in range(seq_len):                      # static & tiny (true batch)
        gates = xg[b:b + 1, :] + jnp.dot(h, whh_ref[...],
                                         preferred_element_type=jnp.float32)
        i_g = jax.nn.sigmoid(gates[:, 0 * H:1 * H])
        f_g = jax.nn.sigmoid(gates[:, 1 * H:2 * H])
        g_g = jnp.tanh(gates[:, 2 * H:3 * H])
        o_g = jax.nn.sigmoid(gates[:, 3 * H:4 * H])
        c = f_g * c + i_g * g_g
        h = o_g * jnp.tanh(c)

    out_ref[...] = (jnp.dot(h, wfc_ref[...], preferred_element_type=jnp.float32)
                    + bfc_ref[...])


@jax.jit
def seq2seq_forward(tokens, lengths, params):
    # Embedding lookup (pure gather) is glue; done in plain JAX.
    emb = params["embedding"][tokens].astype(jnp.float32)      # (B, T, E)
    B, T, E = emb.shape
    H = params["enc_w_hh"].shape[0]
    C = params["w_fc"].shape[1]

    # Pad batch to the 8-sublane granule; tile at 128 rows for large batches.
    if B <= 128:
        B_pad = -(-B // 8) * 8
        B_tile = B_pad
    else:
        B_pad = -(-B // 128) * 128
        B_tile = 128
    pad_b = B_pad - B

    x_tbe = jnp.transpose(emb, (1, 0, 2))                      # time-major (T, B, E)
    x_tbe = jnp.pad(x_tbe, ((0, 0), (0, pad_b), (0, 0)))
    lens2d = jnp.pad(lengths.astype(jnp.int32).reshape(B, 1),
                     ((0, pad_b), (0, 0)), constant_values=1)

    # ---- encoder: batch-parallel grid over tiles (uses both TCs on v7x) ------
    h_enc = pl.pallas_call(
        encoder_lstm_kernel,
        out_shape=jax.ShapeDtypeStruct((B_pad, H), jnp.float32),
        grid=(B_pad // B_tile,),
        in_specs=[
            pl.BlockSpec((T, B_tile, E), lambda i: (0, i, 0)),
            pl.BlockSpec((B_tile, 1), lambda i: (i, 0)),
            pl.BlockSpec((E, 4 * H), lambda i: (0, 0)),
            pl.BlockSpec((H, 4 * H), lambda i: (0, 0)),
            pl.BlockSpec((1, 4 * H), lambda i: (0, 0)),
        ],
        out_specs=pl.BlockSpec((B_tile, H), lambda i: (i, 0)),
        scratch_shapes=[pltpu.VMEM((T, B_tile, 4 * H), jnp.float32)],
        compiler_params=pltpu.CompilerParams(
            dimension_semantics=("parallel",)),
    )(x_tbe, lens2d, params["enc_w_ih"], params["enc_w_hh"], params["enc_b"])

    # ---- decoder LSTM over (batch=1, seq=B) encoder hn + final Linear --------
    logits = pl.pallas_call(
        functools.partial(decoder_fc_kernel, seq_len=B),
        out_shape=jax.ShapeDtypeStruct((1, C), jnp.float32),
        grid=(1,),
        in_specs=[
            pl.BlockSpec((B_pad, H), lambda i: (0, 0)),
            pl.BlockSpec((H, 4 * H), lambda i: (0, 0)),
            pl.BlockSpec((H, 4 * H), lambda i: (0, 0)),
            pl.BlockSpec((1, 4 * H), lambda i: (0, 0)),
            pl.BlockSpec((H, C), lambda i: (0, 0)),
            pl.BlockSpec((1, C), lambda i: (0, 0)),
        ],
        out_specs=pl.BlockSpec((1, C), lambda i: (0, 0)),
        compiler_params=pltpu.CompilerParams(
            dimension_semantics=("arbitrary",)),
    )(h_enc, params["dec_w_ih"], params["dec_w_hh"], params["dec_b"],
      params["w_fc"], params["b_fc"])

    return logits


def init_params(key, vocab_size, embed_dim, hidden_dim, num_classes):
    """Deterministic init mirroring nn.Embedding / nn.LSTM / nn.Linear shapes."""
    ks = jax.random.split(key, 11)
    k_u = 1.0 / np.sqrt(hidden_dim)

    def unif(k, shape):
        return jax.random.uniform(k, shape, jnp.float32, -k_u, k_u)

    # torch layouts: weight_ih (4H, in), weight_hh (4H, H), biases (4H,), fc (C, H)
    enc_w_ih = unif(ks[0], (4 * hidden_dim, embed_dim)).T        # (E, 4H)
    enc_w_hh = unif(ks[1], (4 * hidden_dim, hidden_dim)).T       # (H, 4H)
    enc_b = (unif(ks[2], (4 * hidden_dim,))
             + unif(ks[3], (4 * hidden_dim,))).reshape(1, -1)    # (1, 4H)
    dec_w_ih = unif(ks[4], (4 * hidden_dim, hidden_dim)).T       # (H, 4H)
    dec_w_hh = unif(ks[5], (4 * hidden_dim, hidden_dim)).T       # (H, 4H)
    dec_b = (unif(ks[6], (4 * hidden_dim,))
             + unif(ks[7], (4 * hidden_dim,))).reshape(1, -1)    # (1, 4H)
    w_fc = unif(ks[8], (num_classes, hidden_dim)).T              # (H, C)
    b_fc = unif(ks[9], (num_classes,)).reshape(1, -1)            # (1, C)
    embedding = jax.random.normal(ks[10], (vocab_size, embed_dim), jnp.float32)
    return {
        "embedding": embedding,
        "enc_w_ih": enc_w_ih, "enc_w_hh": enc_w_hh, "enc_b": enc_b,
        "dec_w_ih": dec_w_ih, "dec_w_hh": dec_w_hh, "dec_b": dec_b,
        "w_fc": w_fc, "b_fc": b_fc,
    }


def reference_forward(tokens, lengths, params):
    """Pure-JAX reference matching the PyTorch module's literal semantics."""
    emb = params["embedding"][tokens]
    B, T, _ = emb.shape
    H = params["enc_w_hh"].shape[0]
    lm1 = lengths.astype(jnp.int32).reshape(B, 1) - 1

    def cell(x_t, h, c, wih, whh, b):
        gates = x_t @ wih + h @ whh + b
        i = jax.nn.sigmoid(gates[:, :H])
        f = jax.nn.sigmoid(gates[:, H:2 * H])
        g = jnp.tanh(gates[:, 2 * H:3 * H])
        o = jax.nn.sigmoid(gates[:, 3 * H:])
        c = f * c + i * g
        return o * jnp.tanh(c), c

    h = jnp.zeros((B, H), jnp.float32)
    c = jnp.zeros((B, H), jnp.float32)
    hn = jnp.zeros((B, H), jnp.float32)
    for t in range(T):
        h, c = cell(emb[:, t, :], h, c,
                    params["enc_w_ih"], params["enc_w_hh"], params["enc_b"])
        hn = jnp.where(lm1 == t, h, hn)
    # Decoder: encoder_hn (1, B, H) is a batch-1 sequence of length B.
    hd = jnp.zeros((1, H), jnp.float32)
    cd = jnp.zeros((1, H), jnp.float32)
    for b in range(B):
        hd, cd = cell(hn[b:b + 1, :], hd, cd,
                      params["dec_w_ih"], params["dec_w_hh"], params["dec_b"])
    return hd @ params["w_fc"] + params["b_fc"]


if __name__ == "__main__":
    vocab_size = 50
    embed_dim = 64      # module default
    hidden_dim = 128    # module default (keeps gate slices lane-aligned)
    num_classes = 2
    B, T = 2, 8

    key = jax.random.PRNGKey(0)
    k_params, k_tokens = jax.random.split(key)
    params = init_params(k_params, vocab_size, embed_dim, hidden_dim,
                         num_classes)

    tokens = jax.random.randint(k_tokens, (B, T), 0, vocab_size, jnp.int32)
    lengths = jnp.array([8, 5], dtype=jnp.int32)   # padded-sequence lengths (>= 1)

    logits = seq2seq_forward(tokens, lengths, params)
    jax.block_until_ready(logits)
    assert logits.shape == (1, num_classes)

    ref = reference_forward(tokens, lengths, params)
    np.testing.assert_allclose(np.asarray(logits), np.asarray(ref),
                               rtol=5e-3, atol=5e-3)

    print("KERNEL_OK")
</pallas_src>

<mosaic_0001>
module attributes {stable_mosaic.version = 11 : i64} {
  func.func @encoder_lstm_kernel(%arg0: i32, %arg1: memref<8x8x64xf32, #tpu.memory_space<vmem>>, %arg2: memref<8x1xi32, #tpu.memory_space<vmem>>, %arg3: memref<64x512xf32, #tpu.memory_space<vmem>>, %arg4: memref<128x512xf32, #tpu.memory_space<vmem>>, %arg5: memref<1x512xf32, #tpu.memory_space<vmem>>, %arg6: memref<8x128xf32, #tpu.memory_space<vmem>>, %arg7: memref<8x8x512xf32, #tpu.memory_space<vmem>>) attributes {dimension_semantics = [#tpu.dimension_semantics<parallel>], iteration_bounds = array<i64: 1>, scalar_prefetch = 0 : i64, scratch_operands = 1 : i64, tpu.core_type = #tpu.core_type<tc>, window_params = [{transform_indices = @transform_0, window_bounds = array<i64: 8, 8, 64>}, {transform_indices = @transform_1, window_bounds = array<i64: 8, 1>}, {pipeline_mode = #tpu.pipeline_mode<synchronous>, transform_indices = @transform_2, window_bounds = array<i64: 64, 512>}, {pipeline_mode = #tpu.pipeline_mode<synchronous>, transform_indices = @transform_3, window_bounds = array<i64: 128, 512>}, {pipeline_mode = #tpu.pipeline_mode<synchronous>, transform_indices = @transform_4, window_bounds = array<i64: 1, 512>}, {transform_indices = @transform_5, window_bounds = array<i64: 8, 128>}]} {
    %c0 = arith.constant 0 : index
    %c0_0 = arith.constant 0 : index
    %c0_1 = arith.constant 0 : index
    %0 = vector.load %arg1[%c0, %c0_0, %c0_1] : memref<8x8x64xf32, #tpu.memory_space<vmem>>, vector<8x8x64xf32>
    %1 = vector.shape_cast %0 : vector<8x8x64xf32> to vector<64x64xf32>
    %c0_2 = arith.constant 0 : index
    %c0_3 = arith.constant 0 : index
    %2 = vector.load %arg3[%c0_2, %c0_3] : memref<64x512xf32, #tpu.memory_space<vmem>>, vector<64x512xf32>
    %cst = arith.constant dense<0.000000e+00> : vector<64x512xf32>
    %3 = tpu.matmul %1, %2, %cst {dimension_numbers = #tpu.dot_dimension_numbers<[1], [0], [0], [1], [0, 0, 1, 1], [], []>} : vector<64x64xf32>, vector<64x512xf32>, vector<64x512xf32> -> vector<64x512xf32>
    %c0_4 = arith.constant 0 : index
    %c0_5 = arith.constant 0 : index
    %4 = vector.load %arg5[%c0_4, %c0_5] : memref<1x512xf32, #tpu.memory_space<vmem>>, vector<1x512xf32>
    %5 = vector.broadcast %4 : vector<1x512xf32> to vector<64x512xf32>
    %6 = arith.addf %3, %5 : vector<64x512xf32>
    %7 = vector.shape_cast %6 : vector<64x512xf32> to vector<8x8x512xf32>
    %c0_6 = arith.constant 0 : index
    %c0_7 = arith.constant 0 : index
    %c0_8 = arith.constant 0 : index
    %8 = vector.load %arg7[%c0_6, %c0_7, %c0_8] : memref<8x8x512xf32, #tpu.memory_space<vmem>>, vector<8x8x512xf32>
    tpu.vector_store %arg7[%c0_6, %c0_7, %c0_8], %7 {strides = array<i32>} : memref<8x8x512xf32, #tpu.memory_space<vmem>>, vector<8x8x512xf32>,
    %c0_9 = arith.constant 0 : index
    %c0_10 = arith.constant 0 : index
    %9 = vector.load %arg2[%c0_9, %c0_10] : memref<8x1xi32, #tpu.memory_space<vmem>>, vector<8x1xi32>
    %c1_i32 = arith.constant 1 : i32
    %10 = vector.broadcast %c1_i32 : i32 to vector<8x1xi32>
    %11 = arith.subi %9, %10 : vector<8x1xi32>
    %cst_11 = arith.constant 0.000000e+00 : f32
    %12 = vector.broadcast %cst_11 : f32 to vector<8x128xf32>
    %cst_12 = arith.constant 0.000000e+00 : f32
    %13 = vector.broadcast %cst_12 : f32 to vector<8x128xf32>
    %c0_i32 = arith.constant 0 : i32
    %14 = arith.index_cast %c0_i32 : i32 to index
    %c0_13 = arith.constant 0 : index
    %c0_14 = arith.constant 0 : index
    %15 = vector.load %arg7[%14, %c0_13, %c0_14] : memref<8x8x512xf32, #tpu.memory_space<vmem>>, vector<1x8x512xf32>
    %16 = vector.shape_cast %15 : vector<1x8x512xf32> to vector<8x512xf32>
    %c0_15 = arith.constant 0 : index
    %c0_16 = arith.constant 0 : index
    %17 = vector.load %arg4[%c0_15, %c0_16] : memref<128x512xf32, #tpu.memory_space<vmem>>, vector<128x512xf32>
    %cst_17 = arith.constant dense<0.000000e+00> : vector<8x512xf32>
    %18 = tpu.matmul %12, %17, %cst_17 {dimension_numbers = #tpu.dot_dimension_numbers<[1], [0], [0], [1], [0, 0, 1, 1], [], []>} : vector<8x128xf32>, vector<128x512xf32>, vector<8x512xf32> -> vector<8x512xf32>
    %19 = arith.addf %16, %18 : vector<8x512xf32>
    %20 = vector.extract_strided_slice %19 {offsets = [0, 0], sizes = [8, 128], strides = [1, 1]} : vector<8x512xf32> to vector<8x128xf32>
    %21 = arith.negf %20 : vector<8x128xf32>
    %22 = math.exp %21 : vector<8x128xf32>
    %cst_18 = arith.constant 1.000000e+00 : f32
    %23 = vector.broadcast %cst_18 : f32 to vector<8x128xf32>
    %24 = arith.addf %23, %22 : vector<8x128xf32>
    %25 = arith.divf %23, %24 : vector<8x128xf32>
    %26 = vector.extract_strided_slice %19 {offsets = [0, 128], sizes = [8, 128], strides = [1, 1]} : vector<8x512xf32> to vector<8x128xf32>
    %27 = arith.negf %26 : vector<8x128xf32>
    %28 = math.exp %27 : vector<8x128xf32>
    %cst_19 = arith.constant 1.000000e+00 : f32
    %29 = vector.broadcast %cst_19 : f32 to vector<8x128xf32>
    %30 = arith.addf %29, %28 : vector<8x128xf32>
    %31 = arith.divf %29, %30 : vector<8x128xf32>
    %32 = vector.extract_strided_slice %19 {offsets = [0, 256], sizes = [8, 128], strides = [1, 1]} : vector<8x512xf32> to vector<8x128xf32>
    %33 = math.tanh %32 : vector<8x128xf32>
    %34 = vector.extract_strided_slice %19 {offsets = [0, 384], sizes = [8, 128], strides = [1, 1]} : vector<8x512xf32> to vector<8x128xf32>
    %35 = arith.negf %34 : vector<8x128xf32>
    %36 = math.exp %35 : vector<8x128xf32>
    %cst_20 = arith.constant 1.000000e+00 : f32
    %37 = vector.broadcast %cst_20 : f32 to vector<8x128xf32>
    %38 = arith.addf %37, %36 : vector<8x128xf32>
    %39 = arith.divf %37, %38 : vector<8x128xf32>
    %40 = arith.mulf %31, %13 : vector<8x128xf32>
    %41 = arith.mulf %25, %33 : vector<8x128xf32>
    %42 = arith.addf %40, %41 : vector<8x128xf32>
    %43 = math.tanh %42 : vector<8x128xf32>
    %44 = arith.mulf %39, %43 : vector<8x128xf32>
    %45 = vector.broadcast %c0_i32 : i32 to vector<8x1xi32>
    %46 = arith.cmpi eq, %11, %45 : vector<8x1xi32>
    %47 = vector.shape_cast %46 : vector<8x1xi1> to vector<8x1xi1>
    %48 = vector.broadcast %47 : vector<8x1xi1> to vector<8x128xi1>
    %49 = arith.select %48, %44, %12 : vector<8x128xi1>, vector<8x128xf32>
    %c1_i32_21 = arith.constant 1 : i32
    %50 = arith.index_cast %c1_i32_21 : i32 to index
    %c0_22 = arith.constant 0 : index
    %c0_23 = arith.constant 0 : index
    %51 = vector.load %arg7[%50, %c0_22, %c0_23] : memref<8x8x512xf32, #tpu.memory_space<vmem>>, vector<1x8x512xf32>
    %52 = vector.shape_cast %51 : vector<1x8x512xf32> to vector<8x512xf32>
    %c0_24 = arith.constant 0 : index
    %c0_25 = arith.constant 0 : index
    %53 = vector.load %arg4[%c0_24, %c0_25] : memref<128x512xf32, #tpu.memory_space<vmem>>, vector<128x512xf32>
    %cst_26 = arith.constant dense<0.000000e+00> : vector<8x512xf32>
    %54 = tpu.matmul %44, %53, %cst_26 {dimension_numbers = #tpu.dot_dimension_numbers<[1], [0], [0], [1], [0, 0, 1, 1], [], []>} : vector<8x128xf32>, vector<128x512xf32>, vector<8x512xf32> -> vector<8x512xf32>
    %55 = arith.addf %52, %54 : vector<8x512xf32>
    %56 = vector.extract_strided_slice %55 {offsets = [0, 0], sizes = [8, 128], strides = [1, 1]} : vector<8x512xf32> to vector<8x128xf32>
    %57 = arith.negf %56 : vector<8x128xf32>
    %58 = math.exp %57 : vector<8x128xf32>
    %cst_27 = arith.constant 1.000000e+00 : f32
    %59 = vector.broadcast %cst_27 : f32 to vector<8x128xf32>
    %60 = arith.addf %59, %58 : vector<8x128xf32>
    %61 = arith.divf %59, %60 : vector<8x128xf32>
    %62 = vector.extract_strided_slice %55 {offsets = [0, 128], sizes = [8, 128], strides = [1, 1]} : vector<8x512xf32> to vector<8x128xf32>
    %63 = arith.negf %62 : vector<8x128xf32>
    %64 = math.exp %63 : vector<8x128xf32>
    %cst_28 = arith.constant 1.000000e+00 : f32
    %65 = vector.broadcast %cst_28 : f32 to vector<8x128xf32>
    %66 = arith.addf %65, %64 : vector<8x128xf32>
    %67 = arith.divf %65, %66 : vector<8x128xf32>
    %68 = vector.extract_strided_slice %55 {offsets = [0, 256], sizes = [8, 128], strides = [1, 1]} : vector<8x512xf32> to vector<8x128xf32>
    %69 = math.tanh %68 : vector<8x128xf32>
    %70 = vector.extract_strided_slice %55 {offsets = [0, 384], sizes = [8, 128], strides = [1, 1]} : vector<8x512xf32> to vector<8x128xf32>
    %71 = arith.negf %70 : vector<8x128xf32>
    %72 = math.exp %71 : vector<8x128xf32>
    %cst_29 = arith.constant 1.000000e+00 : f32
    %73 = vector.broadcast %cst_29 : f32 to vector<8x128xf32>
    %74 = arith.addf %73, %72 : vector<8x128xf32>
    %75 = arith.divf %73, %74 : vector<8x128xf32>
    %76 = arith.mulf %67, %42 : vector<8x128xf32>
    %77 = arith.mulf %61, %69 : vector<8x128xf32>
    %78 = arith.addf %76, %77 : vector<8x128xf32>
    %79 = math.tanh %78 : vector<8x128xf32>
    %80 = arith.mulf %75, %79 : vector<8x128xf32>
    %81 = vector.broadcast %c1_i32_21 : i32 to vector<8x1xi32>
    %82 = arith.cmpi eq, %11, %81 : vector<8x1xi32>
    %83 = vector.shape_cast %82 : vector<8x1xi1> to vector<8x1xi1>
    %84 = vector.broadcast %83 : vector<8x1xi1> to vector<8x128xi1>
    %85 = arith.select %84, %80, %49 : vector<8x128xi1>, vector<8x128xf32>
    %c2_i32 = arith.constant 2 : i32
    %86 = arith.index_cast %c2_i32 : i32 to index
    %c0_30 = arith.constant 0 : index
    %c0_31 = arith.constant 0 : index
    %87 = vector.load %arg7[%86, %c0_30, %c0_31] : memref<8x8x512xf32, #tpu.memory_space<vmem>>, vector<1x8x512xf32>
    %88 = vector.shape_cast %87 : vector<1x8x512xf32> to vector<8x512xf32>
    %c0_32 = arith.constant 0 : index
    %c0_33 = arith.constant 0 : index
    %89 = vector.load %arg4[%c0_32, %c0_33] : memref<128x512xf32, #tpu.memory_space<vmem>>, vector<128x512xf32>
    %cst_34 = arith.constant dense<0.000000e+00> : vector<8x512xf32>
    %90 = tpu.matmul %80, %89, %cst_34 {dimension_numbers = #tpu.dot_dimension_numbers<[1], [0], [0], [1], [0, 0, 1, 1], [], []>} : vector<8x128xf32>, vector<128x512xf32>, vector<8x512xf32> -> vector<8x512xf32>
    %91 = arith.addf %88, %90 : vector<8x512xf32>
    %92 = vector.extract_strided_slice %91 {offsets = [0, 0], sizes = [8, 128], strides = [1, 1]} : vector<8x512xf32> to vector<8x128xf32>
    %93 = arith.negf %92 : vector<8x128xf32>
    %94 = math.exp %93 : vector<8x128xf32>
    %cst_35 = arith.constant 1.000000e+00 : f32
    %95 = vector.broadcast %cst_35 : f32 to vector<8x128xf32>
    %96 = arith.addf %95, %94 : vector<8x128xf32>
    %97 = arith.divf %95, %96 : vector<8x128xf32>
    %98 = vector.extract_strided_slice %91 {offsets = [0, 128], sizes = [8, 128], strides = [1, 1]} : vector<8x512xf32> to vector<8x128xf32>
    %99 = arith.negf %98 : vector<8x128xf32>
    %100 = math.exp %99 : vector<8x128xf32>
    %cst_36 = arith.constant 1.000000e+00 : f32
    %101 = vector.broadcast %cst_36 : f32 to vector<8x128xf32>
    %102 = arith.addf %101, %100 : vector<8x128xf32>
    %103 = arith.divf %101, %102 : vector<8x128xf32>
    %104 = vector.extract_strided_slice %91 {offsets = [0, 256], sizes = [8, 128], strides = [1, 1]} : vector<8x512xf32> to vector<8x128xf32>
    %105 = math.tanh %104 : vector<8x128xf32>
    %106 = vector.extract_strided_slice %91 {offsets = [0, 384], sizes = [8, 128], strides = [1, 1]} : vector<8x512xf32> to vector<8x128xf32>
    %107 = arith.negf %106 : vector<8x128xf32>
    %108 = math.exp %107 : vector<8x128xf32>
    %cst_37 = arith.constant 1.000000e+00 : f32
    %109 = vector.broadcast %cst_37 : f32 to vector<8x128xf32>
    %110 = arith.addf %109, %108 : vector<8x128xf32>
    %111 = arith.divf %109, %110 : vector<8x128xf32>
    %112 = arith.mulf %103, %78 : vector<8x128xf32>
    %113 = arith.mulf %97, %105 : vector<8x128xf32>
    %114 = arith.addf %112, %113 : vector<8x128xf32>
    %115 = math.tanh %114 : vector<8x128xf32>
    %116 = arith.mulf %111, %115 : vector<8x128xf32>
    %117 = vector.broadcast %c2_i32 : i32 to vector<8x1xi32>
    %118 = arith.cmpi eq, %11, %117 : vector<8x1xi32>
    %119 = vector.shape_cast %118 : vector<8x1xi1> to vector<8x1xi1>
    %120 = vector.broadcast %119 : vector<8x1xi1> to vector<8x128xi1>
    %121 = arith.select %120, %116, %85 : vector<8x128xi1>, vector<8x128xf32>
    %c3_i32 = arith.constant 3 : i32
    %122 = arith.index_cast %c3_i32 : i32 to index
    %c0_38 = arith.constant 0 : index
    %c0_39 = arith.constant 0 : index
    %123 = vector.load %arg7[%122, %c0_38, %c0_39] : memref<8x8x512xf32, #tpu.memory_space<vmem>>, vector<1x8x512xf32>
    %124 = vector.shape_cast %123 : vector<1x8x512xf32> to vector<8x512xf32>
    %c0_40 = arith.constant 0 : index
    %c0_41 = arith.constant 0 : index
    %125 = vector.load %arg4[%c0_40, %c0_41] : memref<128x512xf32, #tpu.memory_space<vmem>>, vector<128x512xf32>
    %cst_42 = arith.constant dense<0.000000e+00> : vector<8x512xf32>
    %126 = tpu.matmul %116, %125, %cst_42 {dimension_numbers = #tpu.dot_dimension_numbers<[1], [0], [0], [1], [0, 0, 1, 1], [], []>} : vector<8x128xf32>, vector<128x512xf32>, vector<8x512xf32> -> vector<8x512xf32>
    %127 = arith.addf %124, %126 : vector<8x512xf32>
    %128 = vector.extract_strided_slice %127 {offsets = [0, 0], sizes = [8, 128], strides = [1, 1]} : vector<8x512xf32> to vector<8x128xf32>
    %129 = arith.negf %128 : vector<8x128xf32>
    %130 = math.exp %129 : vector<8x128xf32>
    %cst_43 = arith.constant 1.000000e+00 : f32
    %131 = vector.broadcast %cst_43 : f32 to vector<8x128xf32>
    %132 = arith.addf %131, %130 : vector<8x128xf32>
    %133 = arith.divf %131, %132 : vector<8x128xf32>
    %134 = vector.extract_strided_slice %127 {offsets = [0, 128], sizes = [8, 128], strides = [1, 1]} : vector<8x512xf32> to vector<8x128xf32>
    %135 = arith.negf %134 : vector<8x128xf32>
    %136 = math.exp %135 : vector<8x128xf32>
    %cst_44 = arith.constant 1.000000e+00 : f32
    %137 = vector.broadcast %cst_44 : f32 to vector<8x128xf32>
    %138 = arith.addf %137, %136 : vector<8x128xf32>
    %139 = arith.divf %137, %138 : vector<8x128xf32>
    %140 = vector.extract_strided_slice %127 {offsets = [0, 256], sizes = [8, 128], strides = [1, 1]} : vector<8x512xf32> to vector<8x128xf32>
    %141 = math.tanh %140 : vector<8x128xf32>
    %142 = vector.extract_strided_slice %127 {offsets = [0, 384], sizes = [8, 128], strides = [1, 1]} : vector<8x512xf32> to vector<8x128xf32>
    %143 = arith.negf %142 : vector<8x128xf32>
    %144 = math.exp %143 : vector<8x128xf32>
    %cst_45 = arith.constant 1.000000e+00 : f32
    %145 = vector.broadcast %cst_45 : f32 to vector<8x128xf32>
    %146 = arith.addf %145, %144 : vector<8x128xf32>
    %147 = arith.divf %145, %146 : vector<8x128xf32>
    %148 = arith.mulf %139, %114 : vector<8x128xf32>
    %149 = arith.mulf %133, %141 : vector<8x128xf32>
    %150 = arith.addf %148, %149 : vector<8x128xf32>
    %151 = math.tanh %150 : vector<8x128xf32>
    %152 = arith.mulf %147, %151 : vector<8x128xf32>
    %153 = vector.broadcast %c3_i32 : i32 to vector<8x1xi32>
    %154 = arith.cmpi eq, %11, %153 : vector<8x1xi32>
    %155 = vector.shape_cast %154 : vector<8x1xi1> to vector<8x1xi1>
    %156 = vector.broadcast %155 : vector<8x1xi1> to vector<8x128xi1>
    %157 = arith.select %156, %152, %121 : vector<8x128xi1>, vector<8x128xf32>
    %c4_i32 = arith.constant 4 : i32
    %158 = arith.index_cast %c4_i32 : i32 to index
    %c0_46 = arith.constant 0 : index
    %c0_47 = arith.constant 0 : index
    %159 = vector.load %arg7[%158, %c0_46, %c0_47] : memref<8x8x512xf32, #tpu.memory_space<vmem>>, vector<1x8x512xf32>
    %160 = vector.shape_cast %159 : vector<1x8x512xf32> to vector<8x512xf32>
    %c0_48 = arith.constant 0 : index
    %c0_49 = arith.constant 0 : index
    %161 = vector.load %arg4[%c0_48, %c0_49] : memref<128x512xf32, #tpu.memory_space<vmem>>, vector<128x512xf32>
    %cst_50 = arith.constant dense<0.000000e+00> : vector<8x512xf32>
    %162 = tpu.matmul %152, %161, %cst_50 {dimension_numbers = #tpu.dot_dimension_numbers<[1], [0], [0], [1], [0, 0, 1, 1], [], []>} : vector<8x128xf32>, vector<128x512xf32>, vector<8x512xf32> -> vector<8x512xf32>
    %163 = arith.addf %160, %162 : vector<8x512xf32>
    %164 = vector.extract_strided_slice %163 {offsets = [0, 0], sizes = [8, 128], strides = [1, 1]} : vector<8x512xf32> to vector<8x128xf32>
    %165 = arith.negf %164 : vector<8x128xf32>
    %166 = math.exp %165 : vector<8x128xf32>
    %cst_51 = arith.constant 1.000000e+00 : f32
    %167 = vector.broadcast %cst_51 : f32 to vector<8x128xf32>
    %168 = arith.addf %167, %166 : vector<8x128xf32>
    %169 = arith.divf %167, %168 : vector<8x128xf32>
    %170 = vector.extract_strided_slice %163 {offsets = [0, 128], sizes = [8, 128], strides = [1, 1]} : vector<8x512xf32> to vector<8x128xf32>
    %171 = arith.negf %170 : vector<8x128xf32>
    %172 = math.exp %171 : vector<8x128xf32>
    %cst_52 = arith.constant 1.000000e+00 : f32
    %173 = vector.broadcast %cst_52 : f32 to vector<8x128xf32>
    %174 = arith.addf %173, %172 : vector<8x128xf32>
    %175 = arith.divf %173, %174 : vector<8x128xf32>
    %176 = vector.extract_strided_slice %163 {offsets = [0, 256], sizes = [8, 128], strides = [1, 1]} : vector<8x512xf32> to vector<8x128xf32>
    %177 = math.tanh %176 : vector<8x128xf32>
    %178 = vector.extract_strided_slice %163 {offsets = [0, 384], sizes = [8, 128], strides = [1, 1]} : vector<8x512xf32> to vector<8x128xf32>
    %179 = arith.negf %178 : vector<8x128xf32>
    %180 = math.exp %179 : vector<8x128xf32>
    %cst_53 = arith.constant 1.000000e+00 : f32
    %181 = vector.broadcast %cst_53 : f32 to vector<8x128xf32>
    %182 = arith.addf %181, %180 : vector<8x128xf32>
    %183 = arith.divf %181, %182 : vector<8x128xf32>
    %184 = arith.mulf %175, %150 : vector<8x128xf32>
    %185 = arith.mulf %169, %177 : vector<8x128xf32>
    %186 = arith.addf %184, %185 : vector<8x128xf32>
    %187 = math.tanh %186 : vector<8x128xf32>
    %188 = arith.mulf %183, %187 : vector<8x128xf32>
    %189 = vector.broadcast %c4_i32 : i32 to vector<8x1xi32>
    %190 = arith.cmpi eq, %11, %189 : vector<8x1xi32>
    %191 = vector.shape_cast %190 : vector<8x1xi1> to vector<8x1xi1>
    %192 = vector.broadcast %191 : vector<8x1xi1> to vector<8x128xi1>
    %193 = arith.select %192, %188, %157 : vector<8x128xi1>, vector<8x128xf32>
    %c5_i32 = arith.constant 5 : i32
    %194 = arith.index_cast %c5_i32 : i32 to index
    %c0_54 = arith.constant 0 : index
    %c0_55 = arith.constant 0 : index
    %195 = vector.load %arg7[%194, %c0_54, %c0_55] : memref<8x8x512xf32, #tpu.memory_space<vmem>>, vector<1x8x512xf32>
    %196 = vector.shape_cast %195 : vector<1x8x512xf32> to vector<8x512xf32>
    %c0_56 = arith.constant 0 : index
    %c0_57 = arith.constant 0 : index
    %197 = vector.load %arg4[%c0_56, %c0_57] : memref<128x512xf32, #tpu.memory_space<vmem>>, vector<128x512xf32>
    %cst_58 = arith.constant dense<0.000000e+00> : vector<8x512xf32>
    %198 = tpu.matmul %188, %197, %cst_58 {dimension_numbers = #tpu.dot_dimension_numbers<[1], [0], [0], [1], [0, 0, 1, 1], [], []>} : vector<8x128xf32>, vector<128x512xf32>, vector<8x512xf32> -> vector<8x512xf32>
    %199 = arith.addf %196, %198 : vector<8x512xf32>
    %200 = vector.extract_strided_slice %199 {offsets = [0, 0], sizes = [8, 128], strides = [1, 1]} : vector<8x512xf32> to vector<8x128xf32>
    %201 = arith.negf %200 : vector<8x128xf32>
    %202 = math.exp %201 : vector<8x128xf32>
    %cst_59 = arith.constant 1.000000e+00 : f32
    %203 = vector.broadcast %cst_59 : f32 to vector<8x128xf32>
    %204 = arith.addf %203, %202 : vector<8x128xf32>
    %205 = arith.divf %203, %204 : vector<8x128xf32>
    %206 = vector.extract_strided_slice %199 {offsets = [0, 128], sizes = [8, 128], strides = [1, 1]} : vector<8x512xf32> to vector<8x128xf32>
    %207 = arith.negf %206 : vector<8x128xf32>
    %208 = math.exp %207 : vector<8x128xf32>
    %cst_60 = arith.constant 1.000000e+00 : f32
    %209 = vector.broadcast %cst_60 : f32 to vector<8x128xf32>
    %210 = arith.addf %209, %208 : vector<8x128xf32>
    %211 = arith.divf %209, %210 : vector<8x128xf32>
    %212 = vector.extract_strided_slice %199 {offsets = [0, 256], sizes = [8, 128], strides = [1, 1]} : vector<8x512xf32> to vector<8x128xf32>
    %213 = math.tanh %212 : vector<8x128xf32>
    %214 = vector.extract_strided_slice %199 {offsets = [0, 384], sizes = [8, 128], strides = [1, 1]} : vector<8x512xf32> to vector<8x128xf32>
    %215 = arith.negf %214 : vector<8x128xf32>
    %216 = math.exp %215 : vector<8x128xf32>
    %cst_61 = arith.constant 1.000000e+00 : f32
    %217 = vector.broadcast %cst_61 : f32 to vector<8x128xf32>
    %218 = arith.addf %217, %216 : vector<8x128xf32>
    %219 = arith.divf %217, %218 : vector<8x128xf32>
    %220 = arith.mulf %211, %186 : vector<8x128xf32>
    %221 = arith.mulf %205, %213 : vector<8x128xf32>
    %222 = arith.addf %220, %221 : vector<8x128xf32>
    %223 = math.tanh %222 : vector<8x128xf32>
    %224 = arith.mulf %219, %223 : vector<8x128xf32>
    %225 = vector.broadcast %c5_i32 : i32 to vector<8x1xi32>
    %226 = arith.cmpi eq, %11, %225 : vector<8x1xi32>
    %227 = vector.shape_cast %226 : vector<8x1xi1> to vector<8x1xi1>
    %228 = vector.broadcast %227 : vector<8x1xi1> to vector<8x128xi1>
    %229 = arith.select %228, %224, %193 : vector<8x128xi1>, vector<8x128xf32>
    %c6_i32 = arith.constant 6 : i32
    %230 = arith.index_cast %c6_i32 : i32 to index
    %c0_62 = arith.constant 0 : index
    %c0_63 = arith.constant 0 : index
    %231 = vector.load %arg7[%230, %c0_62, %c0_63] : memref<8x8x512xf32, #tpu.memory_space<vmem>>, vector<1x8x512xf32>
    %232 = vector.shape_cast %231 : vector<1x8x512xf32> to vector<8x512xf32>
    %c0_64 = arith.constant 0 : index
    %c0_65 = arith.constant 0 : index
    %233 = vector.load %arg4[%c0_64, %c0_65] : memref<128x512xf32, #tpu.memory_space<vmem>>, vector<128x512xf32>
    %cst_66 = arith.constant dense<0.000000e+00> : vector<8x512xf32>
    %234 = tpu.matmul %224, %233, %cst_66 {dimension_numbers = #tpu.dot_dimension_numbers<[1], [0], [0], [1], [0, 0, 1, 1], [], []>} : vector<8x128xf32>, vector<128x512xf32>, vector<8x512xf32> -> vector<8x512xf32>
    %235 = arith.addf %232, %234 : vector<8x512xf32>
    %236 = vector.extract_strided_slice %235 {offsets = [0, 0], sizes = [8, 128], strides = [1, 1]} : vector<8x512xf32> to vector<8x128xf32>
    %237 = arith.negf %236 : vector<8x128xf32>
    %238 = math.exp %237 : vector<8x128xf32>
    %cst_67 = arith.constant 1.000000e+00 : f32
    %239 = vector.broadcast %cst_67 : f32 to vector<8x128xf32>
    %240 = arith.addf %239, %238 : vector<8x128xf32>
    %241 = arith.divf %239, %240 : vector<8x128xf32>
    %242 = vector.extract_strided_slice %235 {offsets = [0, 128], sizes = [8, 128], strides = [1, 1]} : vector<8x512xf32> to vector<8x128xf32>
    %243 = arith.negf %242 : vector<8x128xf32>
    %244 = math.exp %243 : vector<8x128xf32>
    %cst_68 = arith.constant 1.000000e+00 : f32
    %245 = vector.broadcast %cst_68 : f32 to vector<8x128xf32>
    %246 = arith.addf %245, %244 : vector<8x128xf32>
    %247 = arith.divf %245, %246 : vector<8x128xf32>
    %248 = vector.extract_strided_slice %235 {offsets = [0, 256], sizes = [8, 128], strides = [1, 1]} : vector<8x512xf32> to vector<8x128xf32>
    %249 = math.tanh %248 : vector<8x128xf32>
    %250 = vector.extract_strided_slice %235 {offsets = [0, 384], sizes = [8, 128], strides = [1, 1]} : vector<8x512xf32> to vector<8x128xf32>
    %251 = arith.negf %250 : vector<8x128xf32>
    %252 = math.exp %251 : vector<8x128xf32>
    %cst_69 = arith.constant 1.000000e+00 : f32
    %253 = vector.broadcast %cst_69 : f32 to vector<8x128xf32>
    %254 = arith.addf %253, %252 : vector<8x128xf32>
    %255 = arith.divf %253, %254 : vector<8x128xf32>
    %256 = arith.mulf %247, %222 : vector<8x128xf32>
    %257 = arith.mulf %241, %249 : vector<8x128xf32>
    %258 = arith.addf %256, %257 : vector<8x128xf32>
    %259 = math.tanh %258 : vector<8x128xf32>
    %260 = arith.mulf %255, %259 : vector<8x128xf32>
    %261 = vector.broadcast %c6_i32 : i32 to vector<8x1xi32>
    %262 = arith.cmpi eq, %11, %261 : vector<8x1xi32>
    %263 = vector.shape_cast %262 : vector<8x1xi1> to vector<8x1xi1>
    %264 = vector.broadcast %263 : vector<8x1xi1> to vector<8x128xi1>
    %265 = arith.select %264, %260, %229 : vector<8x128xi1>, vector<8x128xf32>
    %c7_i32 = arith.constant 7 : i32
    %266 = arith.index_cast %c7_i32 : i32 to index
    %c0_70 = arith.constant 0 : index
    %c0_71 = arith.constant 0 : index
    %267 = vector.load %arg7[%266, %c0_70, %c0_71] : memref<8x8x512xf32, #tpu.memory_space<vmem>>, vector<1x8x512xf32>
    %268 = vector.shape_cast %267 : vector<1x8x512xf32> to vector<8x512xf32>
    %c0_72 = arith.constant 0 : index
    %c0_73 = arith.constant 0 : index
    %269 = vector.load %arg4[%c0_72, %c0_73] : memref<128x512xf32, #tpu.memory_space<vmem>>, vector<128x512xf32>
    %cst_74 = arith.constant dense<0.000000e+00> : vector<8x512xf32>
    %270 = tpu.matmul %260, %269, %cst_74 {dimension_numbers = #tpu.dot_dimension_numbers<[1], [0], [0], [1], [0, 0, 1, 1], [], []>} : vector<8x128xf32>, vector<128x512xf32>, vector<8x512xf32> -> vector<8x512xf32>
    %271 = arith.addf %268, %270 : vector<8x512xf32>
    %272 = vector.extract_strided_slice %271 {offsets = [0, 0], sizes = [8, 128], strides = [1, 1]} : vector<8x512xf32> to vector<8x128xf32>
    %273 = arith.negf %272 : vector<8x128xf32>
    %274 = math.exp %273 : vector<8x128xf32>
    %cst_75 = arith.constant 1.000000e+00 : f32
    %275 = vector.broadcast %cst_75 : f32 to vector<8x128xf32>
    %276 = arith.addf %275, %274 : vector<8x128xf32>
    %277 = arith.divf %275, %276 : vector<8x128xf32>
    %278 = vector.extract_strided_slice %271 {offsets = [0, 128], sizes = [8, 128], strides = [1, 1]} : vector<8x512xf32> to vector<8x128xf32>
    %279 = arith.negf %278 : vector<8x128xf32>
    %280 = math.exp %279 : vector<8x128xf32>
    %cst_76 = arith.constant 1.000000e+00 : f32
    %281 = vector.broadcast %cst_76 : f32 to vector<8x128xf32>
    %282 = arith.addf %281, %280 : vector<8x128xf32>
    %283 = arith.divf %281, %282 : vector<8x128xf32>
    %284 = vector.extract_strided_slice %271 {offsets = [0, 256], sizes = [8, 128], strides = [1, 1]} : vector<8x512xf32> to vector<8x128xf32>
    %285 = math.tanh %284 : vector<8x128xf32>
    %286 = vector.extract_strided_slice %271 {offsets = [0, 384], sizes = [8, 128], strides = [1, 1]} : vector<8x512xf32> to vector<8x128xf32>
    %287 = arith.negf %286 : vector<8x128xf32>
    %288 = math.exp %287 : vector<8x128xf32>
    %cst_77 = arith.constant 1.000000e+00 : f32
    %289 = vector.broadcast %cst_77 : f32 to vector<8x128xf32>
    %290 = arith.addf %289, %288 : vector<8x128xf32>
    %291 = arith.divf %289, %290 : vector<8x128xf32>
    %292 = arith.mulf %283, %258 : vector<8x128xf32>
    %293 = arith.mulf %277, %285 : vector<8x128xf32>
    %294 = arith.addf %292, %293 : vector<8x128xf32>
    %295 = math.tanh %294 : vector<8x128xf32>
    %296 = arith.mulf %291, %295 : vector<8x128xf32>
    %297 = vector.broadcast %c7_i32 : i32 to vector<8x1xi32>
    %298 = arith.cmpi eq, %11, %297 : vector<8x1xi32>
    %299 = vector.shape_cast %298 : vector<8x1xi1> to vector<8x1xi1>
    %300 = vector.broadcast %299 : vector<8x1xi1> to vector<8x128xi1>
    %301 = arith.select %300, %296, %265 : vector<8x128xi1>, vector<8x128xf32>
    %c8_i32 = arith.constant 8 : i32
    %c0_78 = arith.constant 0 : index
    %c0_79 = arith.constant 0 : index
    %302 = vector.load %arg6[%c0_78, %c0_79] : memref<8x128xf32, #tpu.memory_space<vmem>>, vector<8x128xf32>
    tpu.vector_store %arg6[%c0_78, %c0_79], %301 {strides = array<i32>} : memref<8x128xf32, #tpu.memory_space<vmem>>, vector<8x128xf32>,
    return
  }
  func.func @transform_0(%arg0: i32) -> (i32, i32, i32) {
    %c0_i32 = arith.constant 0 : i32
    %c0_i32_0 = arith.constant 0 : i32
    %c0_i32_1 = arith.constant 0 : i32
    return %c0_i32, %arg0, %c0_i32_0 : i32, i32, i32
  }
  func.func @transform_1(%arg0: i32) -> (i32, i32) {
    %c0_i32 = arith.constant 0 : i32
    %c0_i32_0 = arith.constant 0 : i32
    return %arg0, %c0_i32 : i32, i32
  }
  func.func @transform_2(%arg0: i32) -> (i32, i32) {
    %c0_i32 = arith.constant 0 : i32
    %c0_i32_0 = arith.constant 0 : i32
    %c0_i32_1 = arith.constant 0 : i32
    return %c0_i32, %c0_i32_0 : i32, i32
  }
  func.func @transform_3(%arg0: i32) -> (i32, i32) {
    %c0_i32 = arith.constant 0 : i32
    %c0_i32_0 = arith.constant 0 : i32
    %c0_i32_1 = arith.constant 0 : i32
    return %c0_i32, %c0_i32_0 : i32, i32
  }
  func.func @transform_4(%arg0: i32) -> (i32, i32) {
    %c0_i32 = arith.constant 0 : i32
    %c0_i32_0 = arith.constant 0 : i32
    %c0_i32_1 = arith.constant 0 : i32
    return %c0_i32, %c0_i32_0 : i32, i32
  }
  func.func @transform_5(%arg0: i32) -> (i32, i32) {
    %c0_i32 = arith.constant 0 : i32
    %c0_i32_0 = arith.constant 0 : i32
    return %arg0, %c0_i32 : i32, i32
  }
}

module attributes {stable_mosaic.version = 11 : i64} {
  func.func @decoder_fc_kernel(%arg0: i32, %arg1: memref<8x128xf32, #tpu.memory_space<vmem>>, %arg2: memref<128x512xf32, #tpu.memory_space<vmem>>, %arg3: memref<128x512xf32, #tpu.memory_space<vmem>>, %arg4: memref<1x512xf32, #tpu.memory_space<vmem>>, %arg5: memref<128x2xf32, #tpu.memory_space<vmem>>, %arg6: memref<1x2xf32, #tpu.memory_space<vmem>>, %arg7: memref<1x2xf32, #tpu.memory_space<vmem>>) attributes {dimension_semantics = [#tpu.dimension_semantics<arbitrary>], iteration_bounds = array<i64: 1>, scalar_prefetch = 0 : i64, scratch_operands = 0 : i64, tpu.core_type = #tpu.core_type<tc>, window_params = [{pipeline_mode = #tpu.pipeline_mode<synchronous>, transform_indices = @transform_0, window_bounds = array<i64: 8, 128>}, {pipeline_mode = #tpu.pipeline_mode<synchronous>, transform_indices = @transform_1, window_bounds = array<i64: 128, 512>}, {pipeline_mode = #tpu.pipeline_mode<synchronous>, transform_indices = @transform_2, window_bounds = array<i64: 128, 512>}, {pipeline_mode = #tpu.pipeline_mode<synchronous>, transform_indices = @transform_3, window_bounds = array<i64: 1, 512>}, {pipeline_mode = #tpu.pipeline_mode<synchronous>, transform_indices = @transform_4, window_bounds = array<i64: 128, 2>}, {pipeline_mode = #tpu.pipeline_mode<synchronous>, transform_indices = @transform_5, window_bounds = array<i64: 1, 2>}, {pipeline_mode = #tpu.pipeline_mode<synchronous>, transform_indices = @transform_6, window_bounds = array<i64: 1, 2>}]} {
    %c0 = arith.constant 0 : index
    %c0_0 = arith.constant 0 : index
    %0 = vector.load %arg1[%c0, %c0_0] : memref<8x128xf32, #tpu.memory_space<vmem>>, vector<8x128xf32>
    %c0_1 = arith.constant 0 : index
    %c0_2 = arith.constant 0 : index
    %1 = vector.load %arg2[%c0_1, %c0_2] : memref<128x512xf32, #tpu.memory_space<vmem>>, vector<128x512xf32>
    %cst = arith.constant dense<0.000000e+00> : vector<8x512xf32>
    %2 = tpu.matmul %0, %1, %cst {dimension_numbers = #tpu.dot_dimension_numbers<[1], [0], [0], [1], [0, 0, 1, 1], [], []>} : vector<8x128xf32>, vector<128x512xf32>, vector<8x512xf32> -> vector<8x512xf32>
    %c0_3 = arith.constant 0 : index
    %c0_4 = arith.constant 0 : index
    %3 = vector.load %arg4[%c0_3, %c0_4] : memref<1x512xf32, #tpu.memory_space<vmem>>, vector<1x512xf32>
    %4 = vector.broadcast %3 : vector<1x512xf32> to vector<8x512xf32>
    %5 = arith.addf %2, %4 : vector<8x512xf32>
    %cst_5 = arith.constant 0.000000e+00 : f32
    %6 = vector.broadcast %cst_5 : f32 to vector<1x128xf32>
    %cst_6 = arith.constant 0.000000e+00 : f32
    %7 = vector.broadcast %cst_6 : f32 to vector<1x128xf32>
    %8 = vector.extract_strided_slice %5 {offsets = [0, 0], sizes = [1, 512], strides = [1, 1]} : vector<8x512xf32> to vector<1x512xf32>
    %c0_7 = arith.constant 0 : index
    %c0_8 = arith.constant 0 : index
    %9 = vector.load %arg3[%c0_7, %c0_8] : memref<128x512xf32, #tpu.memory_space<vmem>>, vector<128x512xf32>
    %cst_9 = arith.constant dense<0.000000e+00> : vector<1x512xf32>
    %10 = tpu.matmul %6, %9, %cst_9 {dimension_numbers = #tpu.dot_dimension_numbers<[1], [0], [0], [1], [0, 0, 1, 1], [], []>} : vector<1x128xf32>, vector<128x512xf32>, vector<1x512xf32> -> vector<1x512xf32>
    %11 = arith.addf %8, %10 : vector<1x512xf32>
    %12 = vector.extract_strided_slice %11 {offsets = [0, 0], sizes = [1, 128], strides = [1, 1]} : vector<1x512xf32> to vector<1x128xf32>
    %13 = arith.negf %12 : vector<1x128xf32>
    %14 = math.exp %13 : vector<1x128xf32>
    %cst_10 = arith.constant 1.000000e+00 : f32
    %15 = vector.broadcast %cst_10 : f32 to vector<1x128xf32>
    %16 = arith.addf %15, %14 : vector<1x128xf32>
    %17 = arith.divf %15, %16 : vector<1x128xf32>
    %18 = vector.extract_strided_slice %11 {offsets = [0, 128], sizes = [1, 128], strides = [1, 1]} : vector<1x512xf32> to vector<1x128xf32>
    %19 = arith.negf %18 : vector<1x128xf32>
    %20 = math.exp %19 : vector<1x128xf32>
    %cst_11 = arith.constant 1.000000e+00 : f32
    %21 = vector.broadcast %cst_11 : f32 to vector<1x128xf32>
    %22 = arith.addf %21, %20 : vector<1x128xf32>
    %23 = arith.divf %21, %22 : vector<1x128xf32>
    %24 = vector.extract_strided_slice %11 {offsets = [0, 256], sizes = [1, 128], strides = [1, 1]} : vector<1x512xf32> to vector<1x128xf32>
    %25 = math.tanh %24 : vector<1x128xf32>
    %26 = vector.extract_strided_slice %11 {offsets = [0, 384], sizes = [1, 128], strides = [1, 1]} : vector<1x512xf32> to vector<1x128xf32>
    %27 = arith.negf %26 : vector<1x128xf32>
    %28 = math.exp %27 : vector<1x128xf32>
    %cst_12 = arith.constant 1.000000e+00 : f32
    %29 = vector.broadcast %cst_12 : f32 to vector<1x128xf32>
    %30 = arith.addf %29, %28 : vector<1x128xf32>
    %31 = arith.divf %29, %30 : vector<1x128xf32>
    %32 = arith.mulf %23, %7 : vector<1x128xf32>
    %33 = arith.mulf %17, %25 : vector<1x128xf32>
    %34 = arith.addf %32, %33 : vector<1x128xf32>
    %35 = math.tanh %34 : vector<1x128xf32>
    %36 = arith.mulf %31, %35 : vector<1x128xf32>
    %37 = vector.extract_strided_slice %5 {offsets = [1, 0], sizes = [1, 512], strides = [1, 1]} : vector<8x512xf32> to vector<1x512xf32>
    %c0_13 = arith.constant 0 : index
    %c0_14 = arith.constant 0 : index
    %38 = vector.load %arg3[%c0_13, %c0_14] : memref<128x512xf32, #tpu.memory_space<vmem>>, vector<128x512xf32>
    %cst_15 = arith.constant dense<0.000000e+00> : vector<1x512xf32>
    %39 = tpu.matmul %36, %38, %cst_15 {dimension_numbers = #tpu.dot_dimension_numbers<[1], [0], [0], [1], [0, 0, 1, 1], [], []>} : vector<1x128xf32>, vector<128x512xf32>, vector<1x512xf32> -> vector<1x512xf32>
    %40 = arith.addf %37, %39 : vector<1x512xf32>
    %41 = vector.extract_strided_slice %40 {offsets = [0, 0], sizes = [1, 128], strides = [1, 1]} : vector<1x512xf32> to vector<1x128xf32>
    %42 = arith.negf %41 : vector<1x128xf32>
    %43 = math.exp %42 : vector<1x128xf32>
    %cst_16 = arith.constant 1.000000e+00 : f32
    %44 = vector.broadcast %cst_16 : f32 to vector<1x128xf32>
    %45 = arith.addf %44, %43 : vector<1x128xf32>
    %46 = arith.divf %44, %45 : vector<1x128xf32>
    %47 = vector.extract_strided_slice %40 {offsets = [0, 128], sizes = [1, 128], strides = [1, 1]} : vector<1x512xf32> to vector<1x128xf32>
    %48 = arith.negf %47 : vector<1x128xf32>
    %49 = math.exp %48 : vector<1x128xf32>
    %cst_17 = arith.constant 1.000000e+00 : f32
    %50 = vector.broadcast %cst_17 : f32 to vector<1x128xf32>
    %51 = arith.addf %50, %49 : vector<1x128xf32>
    %52 = arith.divf %50, %51 : vector<1x128xf32>
    %53 = vector.extract_strided_slice %40 {offsets = [0, 256], sizes = [1, 128], strides = [1, 1]} : vector<1x512xf32> to vector<1x128xf32>
    %54 = math.tanh %53 : vector<1x128xf32>
    %55 = vector.extract_strided_slice %40 {offsets = [0, 384], sizes = [1, 128], strides = [1, 1]} : vector<1x512xf32> to vector<1x128xf32>
    %56 = arith.negf %55 : vector<1x128xf32>
    %57 = math.exp %56 : vector<1x128xf32>
    %cst_18 = arith.constant 1.000000e+00 : f32
    %58 = vector.broadcast %cst_18 : f32 to vector<1x128xf32>
    %59 = arith.addf %58, %57 : vector<1x128xf32>
    %60 = arith.divf %58, %59 : vector<1x128xf32>
    %61 = arith.mulf %52, %34 : vector<1x128xf32>
    %62 = arith.mulf %46, %54 : vector<1x128xf32>
    %63 = arith.addf %61, %62 : vector<1x128xf32>
    %64 = math.tanh %63 : vector<1x128xf32>
    %65 = arith.mulf %60, %64 : vector<1x128xf32>
    %c0_19 = arith.constant 0 : index
    %c0_20 = arith.constant 0 : index
    %66 = vector.load %arg5[%c0_19, %c0_20] : memref<128x2xf32, #tpu.memory_space<vmem>>, vector<128x2xf32>
    %cst_21 = arith.constant dense<0.000000e+00> : vector<1x2xf32>
    %67 = tpu.matmul %65, %66, %cst_21 {dimension_numbers = #tpu.dot_dimension_numbers<[1], [0], [0], [1], [0, 0, 1, 1], [], []>} : vector<1x128xf32>, vector<128x2xf32>, vector<1x2xf32> -> vector<1x2xf32>
    %c0_22 = arith.constant 0 : index
    %c0_23 = arith.constant 0 : index
    %68 = vector.load %arg6[%c0_22, %c0_23] : memref<1x2xf32, #tpu.memory_space<vmem>>, vector<1x2xf32>
    %69 = arith.addf %67, %68 : vector<1x2xf32>
    %c0_24 = arith.constant 0 : index
    %c0_25 = arith.constant 0 : index
    %70 = vector.load %arg7[%c0_24, %c0_25] : memref<1x2xf32, #tpu.memory_space<vmem>>, vector<1x2xf32>
    tpu.vector_store %arg7[%c0_24, %c0_25], %69 {strides = array<i32>} : memref<1x2xf32, #tpu.memory_space<vmem>>, vector<1x2xf32>,
    return
  }
  func.func @transform_0(%arg0: i32) -> (i32, i32) {
    %c0_i32 = arith.constant 0 : i32
    %c0_i32_0 = arith.constant 0 : i32
    %c0_i32_1 = arith.constant 0 : i32
    return %c0_i32, %c0_i32_0 : i32, i32
  }
  func.func @transform_1(%arg0: i32) -> (i32, i32) {
    %c0_i32 = arith.constant 0 : i32
    %c0_i32_0 = arith.constant 0 : i32
    %c0_i32_1 = arith.constant 0 : i32
    return %c0_i32, %c0_i32_0 : i32, i32
  }
  func.func @transform_2(%arg0: i32) -> (i32, i32) {
    %c0_i32 = arith.constant 0 : i32
    %c0_i32_0 = arith.constant 0 : i32
    %c0_i32_1 = arith.constant 0 : i32
    return %c0_i32, %c0_i32_0 : i32, i32
  }
  func.func @transform_3(%arg0: i32) -> (i32, i32) {
    %c0_i32 = arith.constant 0 : i32
    %c0_i32_0 = arith.constant 0 : i32
    %c0_i32_1 = arith.constant 0 : i32
    return %c0_i32, %c0_i32_0 : i32, i32
  }
  func.func @transform_4(%arg0: i32) -> (i32, i32) {
    %c0_i32 = arith.constant 0 : i32
    %c0_i32_0 = arith.constant 0 : i32
    %c0_i32_1 = arith.constant 0 : i32
    return %c0_i32, %c0_i32_0 : i32, i32
  }
  func.func @transform_5(%arg0: i32) -> (i32, i32) {
    %c0_i32 = arith.constant 0 : i32
    %c0_i32_0 = arith.constant 0 : i32
    %c0_i32_1 = arith.constant 0 : i32
    return %c0_i32, %c0_i32_0 : i32, i32
  }
  func.func @transform_6(%arg0: i32) -> (i32, i32) {
    %c0_i32 = arith.constant 0 : i32
    %c0_i32_0 = arith.constant 0 : i32
    %c0_i32_1 = arith.constant 0 : i32
    return %c0_i32, %c0_i32_0 : i32, i32
  }
}

</mosaic_0001>

<bundles_post_ra>
// kernel: seq2seq_forward.3
= control target key start
LH: loop header
LB: loop body
LE: loop exit
PB: predicated region body
PF: predicated region fallthrough
CT: control target
= control target key end

     0   :  { %v1112_v7 = vmov 0.0   ;;  %s1721_s0 = inlined_call_operand.vmem [shape: f32[8,128], index: 0, kind: input, shape index: {}]   ;;  %s1722_s1 = inlined_call_operand.vmem [shape: f32[128,512], index: 1, kind: input, shape index: {}]   ;;  %s1723_s2 = inlined_call_operand.vmem [shape: f32[128,512], index: 2, kind: input, shape index: {}]   ;;  %s1724_s3 = inlined_call_operand.vmem [shape: f32[1,512], index: 3, kind: input, shape index: {}]   ;;  %s1725_s4 = inlined_call_operand.vmem [shape: f32[128,2], index: 4, kind: input, shape index: {}]   ;;  %s1726_s5 = inlined_call_operand.vmem [shape: f32[1,2], index: 5, kind: input, shape index: {}]   ;;  %s1727_s6 = inlined_call_operand.hbm [shape: f32[1,2], index: 6, kind: output, shape index: {}]  }
   0x1   :  { %v26_v0 = vld [vmem:[%s1722_s1 + $0x8] sm:$0xff]  ;;  %v28_v2 = vld [vmem:[%s1722_s1 + $0x18] sm:$0xff]  ;;  %v25_v5 = vld [vmem:[%s1722_s1] sm:$0xff]  ;;  %175 = vmatprep.mubr.f32.mxu0 %v1112_v7  ;;  %246 = vmatprep.mubr.f32.mxu1 %v1112_v7 }
   0x2   :  { %v30_v1 = vld [vmem:[%s1722_s1 + $0x28] sm:$0xff]  ;;  %v32_v4 = vld [vmem:[%s1722_s1 + $0x38] sm:$0xff]  ;;  %v29_v6 = vld [vmem:[%s1722_s1 + $0x20] sm:$0xff] }
   0x3   :  { %v836_v3 = vpack.c.bf16 %v30_v1, %v26_v0  ;;  %v868_v8 = vpack.c.bf16 %v32_v4, %v28_v2  ;;  %v838_v9 = vpack.c.bf16 %v29_v6, %v25_v5  ;;  %v27_v10 = vld [vmem:[%s1722_s1 + $0x10] sm:$0xff]  ;;  %v34_v12 = vld [vmem:[%s1722_s1 + $0x48] sm:$0xff]  ;;  %v36_v15 = vld [vmem:[%s1722_s1 + $0x58] sm:$0xff] }
   0x4   :  { %v31_v11 = vld [vmem:[%s1722_s1 + $0x30] sm:$0xff]  ;;  %v38_v14 = vld [vmem:[%s1722_s1 + $0x68] sm:$0xff]  ;;  %v40_v16 = vld [vmem:[%s1722_s1 + $0x78] sm:$0xff] }
   0x5   :  { %837 = vmatprep.subr.bf16.mxu0 %v836_v3  ;;  %v870_v13 = vpack.c.bf16 %v31_v11, %v27_v10  ;;  %869 = vmatprep.subr.bf16.mxu1 %v868_v8  ;;  %v840_v17 = vpack.c.bf16 %v38_v14, %v34_v12  ;;  %v872_v18 = vpack.c.bf16 %v40_v16, %v36_v15  ;;  %v33_v19 = vld [vmem:[%s1722_s1 + $0x40] sm:$0xff]  ;;  %v35_v21 = vld [vmem:[%s1722_s1 + $0x50] sm:$0xff]  ;;  %v42_v24 = vld [vmem:[%s1722_s1 + $0x88] sm:$0xff] }
   0x6   :  { %839 = vmatpush1.bf16.msra.mxu0 %v838_v9  ;;  %v37_v20 = vld [vmem:[%s1722_s1 + $0x60] sm:$0xff]  ;;  %v39_v23 = vld [vmem:[%s1722_s1 + $0x70] sm:$0xff]  ;;  %v46_v25 = vld [vmem:[%s1722_s1 + $0xa8] sm:$0xff] }
   0x7   :  { %871 = vmatpush1.bf16.msra.mxu1 %v870_v13  ;;  %v842_v22 = vpack.c.bf16 %v37_v20, %v33_v19  ;;  %841 = vmatprep.subr.bf16.mxu0 %v840_v17  ;;  %v874_v26 = vpack.c.bf16 %v39_v23, %v35_v21  ;;  %v844_v27 = vpack.c.bf16 %v46_v25, %v42_v24  ;;  %v44_v28 = vld [vmem:[%s1722_s1 + $0x98] sm:$0xff]  ;;  %v41_v30 = vld [vmem:[%s1722_s1 + $0x80] sm:$0xff]  ;;  %v43_v33 = vld [vmem:[%s1722_s1 + $0x90] sm:$0xff] }
   0x8   :  { %873 = vmatprep.subr.bf16.mxu1 %v872_v18  ;;  %v48_v29 = vld [vmem:[%s1722_s1 + $0xb8] sm:$0xff]  ;;  %v45_v32 = vld [vmem:[%s1722_s1 + $0xa0] sm:$0xff]  ;;  %v47_v34 = vld [vmem:[%s1722_s1 + $0xb0] sm:$0xff] }
   0x9   :  { %v876_v31 = vpack.c.bf16 %v48_v29, %v44_v28  ;;  %v846_v35 = vpack.c.bf16 %v45_v32, %v41_v30  ;;  %v50_v36 = vld [vmem:[%s1722_s1 + $0xc8] sm:$0xff]  ;;  %v52_v38 = vld [vmem:[%s1722_s1 + $0xd8] sm:$0xff]  ;;  %v878_v39 = vpack.c.bf16 %v47_v34, %v43_v33  ;;  %v49_v42 = vld [vmem:[%s1722_s1 + $0xc0] sm:$0xff] }
   0xa   :  { %843 = vmatpush1.bf16.msra.mxu0 %v842_v22  ;;  %v54_v37 = vld [vmem:[%s1722_s1 + $0xe8] sm:$0xff]  ;;  %v56_v41 = vld [vmem:[%s1722_s1 + $0xf8] sm:$0xff]  ;;  %v53_v43 = vld [vmem:[%s1722_s1 + $0xe0] sm:$0xff] }
   0xb   :  { %875 = vmatpush1.bf16.msra.mxu1 %v874_v26  ;;  %845 = vmatprep.subr.bf16.mxu0 %v844_v27  ;;  %v848_v40 = vpack.c.bf16 %v54_v37, %v50_v36  ;;  %v880_v44 = vpack.c.bf16 %v56_v41, %v52_v38  ;;  %v51_v45 = vld [vmem:[%s1722_s1 + $0xd0] sm:$0xff]  ;;  %v58_v47 = vld [vmem:[%s1722_s1 + $0x108] sm:$0xff]  ;;  %v60_v49 = vld [vmem:[%s1722_s1 + $0x118] sm:$0xff]  ;;  %v850_v51 = vpack.c.bf16 %v53_v43, %v49_v42 }
   0xc   :  { %877 = vmatprep.subr.bf16.mxu1 %v876_v31  ;;  %v55_v46 = vld [vmem:[%s1722_s1 + $0xf0] sm:$0xff]  ;;  %v62_v48 = vld [vmem:[%s1722_s1 + $0x128] sm:$0xff]  ;;  %v64_v50 = vld [vmem:[%s1722_s1 + $0x138] sm:$0xff] }
   0xd   :  { %v882_v52 = vpack.c.bf16 %v55_v46, %v51_v45  ;;  %v852_v53 = vpack.c.bf16 %v62_v48, %v58_v47  ;;  %v57_v54 = vld [vmem:[%s1722_s1 + $0x100] sm:$0xff]  ;;  %v59_v56 = vld [vmem:[%s1722_s1 + $0x110] sm:$0xff]  ;;  %v884_v57 = vpack.c.bf16 %v64_v50, %v60_v49  ;;  %v66_v59 = vld [vmem:[%s1722_s1 + $0x148] sm:$0xff] }
   0xe   :  { %847 = vmatpush1.bf16.msra.mxu0 %v846_v35  ;;  %v61_v55 = vld [vmem:[%s1722_s1 + $0x120] sm:$0xff]  ;;  %v63_v58 = vld [vmem:[%s1722_s1 + $0x130] sm:$0xff]  ;;  %v70_v60 = vld [vmem:[%s1722_s1 + $0x168] sm:$0xff] }
   0xf   :  { %879 = vmatpush1.bf16.msra.mxu1 %v878_v39  ;;  %849 = vmatprep.subr.bf16.mxu0 %v848_v40  ;;  %v68_v61 = vld [vmem:[%s1722_s1 + $0x158] sm:$0xff]  ;;  %v854_v63 = vpack.c.bf16 %v61_v55, %v57_v54  ;;  %v886_v0 = vpack.c.bf16 %v63_v58, %v59_v56  ;;  %v856_v1 = vpack.c.bf16 %v70_v60, %v66_v59  ;;  %v65_v2 = vld [vmem:[%s1722_s1 + $0x140] sm:$0xff]  ;;  %v67_v4 = vld [vmem:[%s1722_s1 + $0x150] sm:$0xff] }
  0x10   :  { %881 = vmatprep.subr.bf16.mxu1 %v880_v44  ;;  %v72_v62 = vld [vmem:[%s1722_s1 + $0x178] sm:$0xff]  ;;  %v69_v3 = vld [vmem:[%s1722_s1 + $0x160] sm:$0xff]  ;;  %v71_v6 = vld [vmem:[%s1722_s1 + $0x170] sm:$0xff] }
  0x11   :  { %v888_v5 = vpack.c.bf16 %v72_v62, %v68_v61  ;;  %v74_v8 = vld [vmem:[%s1722_s1 + $0x188] sm:$0xff]  ;;  %v76_v10 = vld [vmem:[%s1722_s1 + $0x198] sm:$0xff]  ;;  %v858_v12 = vpack.c.bf16 %v69_v3, %v65_v2  ;;  %v890_v13 = vpack.c.bf16 %v71_v6, %v67_v4  ;;  %v73_v15 = vld [vmem:[%s1722_s1 + $0x180] sm:$0xff] }
  0x12   :  { %851 = vmatpush1.bf16.msra.mxu0 %v850_v51  ;;  %v78_v9 = vld [vmem:[%s1722_s1 + $0x1a8] sm:$0xff]  ;;  %v80_v11 = vld [vmem:[%s1722_s1 + $0x1b8] sm:$0xff]  ;;  %v77_v16 = vld [vmem:[%s1722_s1 + $0x1a0] sm:$0xff] }
  0x13   :  { %883 = vmatpush1.bf16.msra.mxu1 %v882_v52  ;;  %853 = vmatprep.subr.bf16.mxu0 %v852_v53  ;;  %v860_v14 = vpack.c.bf16 %v78_v9, %v74_v8  ;;  %v75_v17 = vld [vmem:[%s1722_s1 + $0x190] sm:$0xff]  ;;  %v892_v18 = vpack.c.bf16 %v80_v11, %v76_v10  ;;  %v82_v20 = vld [vmem:[%s1722_s1 + $0x1c8] sm:$0xff]  ;;  %v84_v22 = vld [vmem:[%s1722_s1 + $0x1d8] sm:$0xff]  ;;  %v862_v24 = vpack.c.bf16 %v77_v16, %v73_v15 }
  0x14   :  { %885 = vmatprep.subr.bf16.mxu1 %v884_v57  ;;  %v79_v19 = vld [vmem:[%s1722_s1 + $0x1b0] sm:$0xff]  ;;  %v86_v21 = vld [vmem:[%s1722_s1 + $0x1e8] sm:$0xff]  ;;  %v88_v23 = vld [vmem:[%s1722_s1 + $0x1f8] sm:$0xff] }
  0x15   :  { %v894_v25 = vpack.c.bf16 %v79_v19, %v75_v17  ;;  %v864_v26 = vpack.c.bf16 %v86_v21, %v82_v20  ;;  %v81_v27 = vld [vmem:[%s1722_s1 + $0x1c0] sm:$0xff]  ;;  %v83_v29 = vld [vmem:[%s1722_s1 + $0x1d0] sm:$0xff]  ;;  %v896_v30 = vpack.c.bf16 %v88_v23, %v84_v22  ;;  %v254_v32 = vld [vmem:[%s1723_s2 + $0x8] sm:$0xff] }
  0x16   :  { %855 = vmatpush1.bf16.msra.mxu0 %v854_v63  ;;  %v85_v28 = vld [vmem:[%s1722_s1 + $0x1e0] sm:$0xff]  ;;  %v87_v31 = vld [vmem:[%s1722_s1 + $0x1f0] sm:$0xff]  ;;  %v258_v33 = vld [vmem:[%s1723_s2 + $0x28] sm:$0xff] }
  0x17   :  { %887 = vmatpush1.bf16.msra.mxu1 %v886_v0  ;;  %857 = vmatprep.subr.bf16.mxu0 %v856_v1  ;;  %v256_v34 = vld [vmem:[%s1723_s2 + $0x18] sm:$0xff]  ;;  %v866_v36 = vpack.c.bf16 %v85_v28, %v81_v27  ;;  %v898_v37 = vpack.c.bf16 %v87_v31, %v83_v29  ;;  %v1357_v38 = vpack.c.bf16 %v258_v33, %v254_v32  ;;  %v253_v39 = vld [vmem:[%s1723_s2] sm:$0xff]  ;;  %v255_v41 = vld [vmem:[%s1723_s2 + $0x10] sm:$0xff] }
  0x18   :  { %889 = vmatprep.subr.bf16.mxu1 %v888_v5  ;;  %v260_v35 = vld [vmem:[%s1723_s2 + $0x38] sm:$0xff]  ;;  %v257_v40 = vld [vmem:[%s1723_s2 + $0x20] sm:$0xff]  ;;  %v259_v43 = vld [vmem:[%s1723_s2 + $0x30] sm:$0xff] }
  0x19   :  { %v1368_v42 = vpack.c.bf16 %v260_v35, %v256_v34  ;;  %v262_v44 = vld [vmem:[%s1723_s2 + $0x48] sm:$0xff]  ;;  %v264_v46 = vld [vmem:[%s1723_s2 + $0x58] sm:$0xff]  ;;  %v24_v48 = vld [vmem:[%s1721_s0] sm:$0xff]  ;;  %v1388_v49 = vpack.c.bf16 %v257_v40, %v253_v39  ;;  %v1391_v50 = vpack.c.bf16 %v259_v43, %v255_v41 }
  0x1a   :  { %859 = vmatpush1.bf16.msra.mxu0 %v858_v12  ;;  %v266_v45 = vld [vmem:[%s1723_s2 + $0x68] sm:$0xff]  ;;  %v268_v47 = vld [vmem:[%s1723_s2 + $0x78] sm:$0xff]  ;;  %v261_v52 = vld [vmem:[%s1723_s2 + $0x40] sm:$0xff] }
  0x1b   :  { %891 = vmatpush1.bf16.msra.mxu1 %v890_v13  ;;  %861 = vmatprep.subr.bf16.mxu0 %v860_v14  ;;  %v1393_v51 = vpack.c.bf16 %v266_v45, %v262_v44  ;;  %v265_v53 = vld [vmem:[%s1723_s2 + $0x60] sm:$0xff]  ;;  %v263_v54 = vld [vmem:[%s1723_s2 + $0x50] sm:$0xff]  ;;  %v1405_v55 = vpack.c.bf16 %v268_v47, %v264_v46  ;;  %v270_v57 = vld [vmem:[%s1723_s2 + $0x88] sm:$0xff] }
  0x1c   :  { %893 = vmatprep.subr.bf16.mxu1 %v892_v18  ;;  %v267_v56 = vld [vmem:[%s1723_s2 + $0x70] sm:$0xff]  ;;  %v274_v58 = vld [vmem:[%s1723_s2 + $0xa8] sm:$0xff]  ;;  %v272_v59 = vld [vmem:[%s1723_s2 + $0x98] sm:$0xff]  ;;  %v1423_v61 = vpack.c.bf16 %v265_v53, %v261_v52 }
  0x1d   :  { %v276_v60 = vld [vmem:[%s1723_s2 + $0xb8] sm:$0xff]  ;;  %v1427_v62 = vpack.c.bf16 %v267_v56, %v263_v54  ;;  %v1429_v63 = vpack.c.bf16 %v274_v58, %v270_v57  ;;  %v269_v0 = vld [vmem:[%s1723_s2 + $0x80] sm:$0xff]  ;;  %v271_v2 = vld [vmem:[%s1723_s2 + $0x90] sm:$0xff] }
  0x1e   :  { %863 = vmatpush1.bf16.msra.mxu0 %v862_v24  ;;  %v273_v1 = vld [vmem:[%s1723_s2 + $0xa0] sm:$0xff]  ;;  %v1441_v3 = vpack.c.bf16 %v276_v60, %v272_v59  ;;  %v275_v4 = vld [vmem:[%s1723_s2 + $0xb0] sm:$0xff]  ;;  %v278_v5 = vld [vmem:[%s1723_s2 + $0xc8] sm:$0xff] }
  0x1f   :  { %895 = vmatpush1.bf16.msra.mxu1 %v894_v25  ;;  %865 = vmatprep.subr.bf16.mxu0 %v864_v26  ;;  %v282_v6 = vld [vmem:[%s1723_s2 + $0xe8] sm:$0xff]  ;;  %v280_v8 = vld [vmem:[%s1723_s2 + $0xd8] sm:$0xff]  ;;  %v1461_v10 = vpack.c.bf16 %v273_v1, %v269_v0  ;;  %v1465_v11 = vpack.c.bf16 %v275_v4, %v271_v2  ;;  %v277_v13 = vld [vmem:[%s1723_s2 + $0xc0] sm:$0xff] }
  0x20   :  { %897 = vmatprep.subr.bf16.mxu1 %v896_v30  ;;  %v284_v9 = vld [vmem:[%s1723_s2 + $0xf8] sm:$0xff]  ;;  %v1467_v12 = vpack.c.bf16 %v282_v6, %v278_v5  ;;  %v281_v14 = vld [vmem:[%s1723_s2 + $0xe0] sm:$0xff]  ;;  %v279_v15 = vld [vmem:[%s1723_s2 + $0xd0] sm:$0xff] }
  0x21   :  { %v1479_v16 = vpack.c.bf16 %v284_v9, %v280_v8  ;;  %v283_v17 = vld [vmem:[%s1723_s2 + $0xf0] sm:$0xff]  ;;  %v286_v18 = vld [vmem:[%s1723_s2 + $0x108] sm:$0xff]  ;;  %v288_v20 = vld [vmem:[%s1723_s2 + $0x118] sm:$0xff] }
  0x22   :  { %867 = vmatpush1.bf16.msra.mxu0 %v866_v36  ;;  %v290_v19 = vld [vmem:[%s1723_s2 + $0x128] sm:$0xff]  ;;  %v292_v21 = vld [vmem:[%s1723_s2 + $0x138] sm:$0xff] }
  0x23   :  { %899 = vmatpush1.bf16.msra.mxu1 %v898_v37  ;;  %901 = vmatprep.subr.bf16.mxu0 %v1357_v38 }
  0x24   :  { %933 = vmatprep.subr.bf16.mxu1 %v1368_v42 }
  0x25   :  { %176 = vmatmul.mubr.f32.vlgmr.msra.gmra.mrb[0].mxu0 %v24_v48 }
  0x26   :  { %247 = vmatmul.mubr.f32.vlgmr.msra.gmra.mrb[0].mxu1 %v24_v48  ;;  %903 = vmatpush1.bf16.msra.mxu0 %v1388_v49 }
  0x27   :  { %935 = vmatpush1.bf16.msra.mxu1 %v1391_v50  ;;  %905 = vmatprep.subr.bf16.mxu0 %v1393_v51 }
  0x28   :  { %937 = vmatprep.subr.bf16.mxu1 %v1405_v55  ;;  %381 = vmatprep.mubr.f32.mxu0 %v1112_v7 }
  0x29   :  { %452 = vmatprep.mubr.f32.mxu1 %v1112_v7 }
  0x2a   :  { %907 = vmatpush1.bf16.msra.mxu0 %v1423_v61 }
  0x2b   :  { %939 = vmatpush1.bf16.msra.mxu1 %v1427_v62  ;;  %909 = vmatprep.subr.bf16.mxu0 %v1429_v63 }
  0x2c   :  { %941 = vmatprep.subr.bf16.mxu1 %v1441_v3 }
  0x2d   :  { %11 = vsyncpa [#allocation3], 0  ;;  %v1497_v22 = vpack.c.bf16 %v281_v14, %v277_v13  ;;  %v1501_v23 = vpack.c.bf16 %v283_v17, %v279_v15  ;;  %v1503_v24 = vpack.c.bf16 %v290_v19, %v286_v18  ;;  %v285_v25 = vld [vmem:[%s1723_s2 + $0x100] sm:$0xff]  ;;  %v287_v27 = vld [vmem:[%s1723_s2 + $0x110] sm:$0xff]  ;;  %v1515_v28 = vpack.c.bf16 %v292_v21, %v288_v20  ;;  %s1115_s11 = smov [#allocation2]  }
  0x2e   :  { %911 = vmatpush1.bf16.msra.mxu0 %v1461_v10  ;;  %v289_v26 = vld [vmem:[%s1723_s2 + $0x120] sm:$0xff]  ;;  %v291_v29 = vld [vmem:[%s1723_s2 + $0x130] sm:$0xff]  ;;  %v294_v30 = vld [vmem:[%s1723_s2 + $0x148] sm:$0xff]  ;;  %vm1114_vm0 = vmmov 0   ;;  %s770_s0 = sshll.u32 %s1115_s11, 4  ;;  %vm762_vm1 = vcmask 8192   ;;  %s771_s0 = int_to_ptr.vmem [resolvable:$true] %s770_s0 }
  0x2f   :  { %943 = vmatpush1.bf16.msra.mxu1 %v1465_v11  ;;  %913 = vmatprep.subr.bf16.mxu0 %v1467_v12  ;;  %v298_v31 = vld [vmem:[%s1723_s2 + $0x168] sm:$0xff]  ;;  %v296_v32 = vld [vmem:[%s1723_s2 + $0x158] sm:$0xff]  ;;  %v1533_v34 = vpack.c.bf16 %v289_v26, %v285_v25  ;;  %v1537_v35 = vpack.c.bf16 %v291_v29, %v287_v27  ;;  %v293_v37 = vld [vmem:[%s1723_s2 + $0x140] sm:$0xff]  ;;  %s1088_s12 = scalar_lea.vmem %s771_s0, 16  ;;  %s1092_s1 = scalar_lea.vmem %s771_s0, 32 }
  0x30   :  { %945 = vmatprep.subr.bf16.mxu1 %v1479_v16  ;;  %v300_v33 = vld [vmem:[%s1723_s2 + $0x178] sm:$0xff]  ;;  %v1539_v36 = vpack.c.bf16 %v298_v31, %v294_v30  ;;  %v297_v39 = vld [vmem:[%s1723_s2 + $0x160] sm:$0xff]  ;;  %v295_v40 = vld [vmem:[%s1723_s2 + $0x150] sm:$0xff]  ;;  %p1089_p0 = scmp.ne.s32.totalorder %s771_s0, %s1088_s12  ;;  %p1093_p1 = scmp.lt.s32.totalorder %s771_s0, %s771_s0 }
  0x31   :  { %v1551_v41 = vpack.c.bf16 %v300_v33, %v296_v32  ;;  %v299_v43 = vld [vmem:[%s1723_s2 + $0x170] sm:$0xff]  ;;  %v302_v44 = vld [vmem:[%s1723_s2 + $0x188] sm:$0xff]  ;;  %v304_v46 = vld [vmem:[%s1723_s2 + $0x198] sm:$0xff]  ;;  %v922_v48 = vpack.c.bf16 %v297_v39, %v293_v37  ;;  %p1094_p2 = scmp.lt.s32.totalorder %s1092_s1, %s1088_s12 }
  0x32   :  { %915 = vmatpush1.bf16.msra.mxu0 %v1497_v22  ;;  %v306_v45 = vld [vmem:[%s1723_s2 + $0x1a8] sm:$0xff]  ;;  %v308_v47 = vld [vmem:[%s1723_s2 + $0x1b8] sm:$0xff]  ;;  %v954_v52 = vpack.c.bf16 %v299_v43, %v295_v40  ;;  %v301_v54 = vld [vmem:[%s1723_s2 + $0x180] sm:$0xff] }
  0x33   :  { %947 = vmatpush1.bf16.msra.mxu1 %v1501_v23  ;;  %917 = vmatprep.subr.bf16.mxu0 %v1503_v24  ;;  %v924_v53 = vpack.c.bf16 %v306_v45, %v302_v44  ;;  %v305_v56 = vld [vmem:[%s1723_s2 + $0x1a0] sm:$0xff]  ;;  %v303_v57 = vld [vmem:[%s1723_s2 + $0x190] sm:$0xff]  ;;  %v956_v58 = vpack.c.bf16 %v308_v47, %v304_v46  ;;  %v310_v60 = vld [vmem:[%s1723_s2 + $0x1c8] sm:$0xff]  ;;  %p1095_p3 = por %p1094_p2, %p1093_p1 }
  0x34   :  { %949 = vmatprep.subr.bf16.mxu1 %v1515_v28  ;;  %v307_v59 = vld [vmem:[%s1723_s2 + $0x1b0] sm:$0xff]  ;;  %v314_v0 = vld [vmem:[%s1723_s2 + $0x1e8] sm:$0xff]  ;;  %v312_v1 = vld [vmem:[%s1723_s2 + $0x1d8] sm:$0xff]  ;;  %v926_v4 = vpack.c.bf16 %v305_v56, %v301_v54 }
  0x35   :  { %v316_v2 = vld [vmem:[%s1723_s2 + $0x1f8] sm:$0xff]  ;;  %v958_v5 = vpack.c.bf16 %v307_v59, %v303_v57  ;;  %v928_v6 = vpack.c.bf16 %v314_v0, %v310_v60  ;;  %v309_v8 = vld [vmem:[%s1723_s2 + $0x1c0] sm:$0xff]  ;;  %v311_v14 = vld [vmem:[%s1723_s2 + $0x1d0] sm:$0xff]  ;;  %v1113_v59 = vmov 0.0|0.0   ;;  %p1096_p4 = pnand %p1095_p3, %p1089_p0 }
  0x36   :  { %919 = vmatpush1.bf16.msra.mxu0 %v1533_v34  ;;  %v313_v9 = vld [vmem:[%s1723_s2 + $0x1e0] sm:$0xff]  ;;  %v960_v13 = vpack.c.bf16 %v316_v2, %v312_v1  ;;  %v315_v15 = vld [vmem:[%s1723_s2 + $0x1f0] sm:$0xff]  ;;  %v673_v57 = vld [vmem:[%s1725_s4 + $0x8] sm:$0xff] }
  0x37   :  { %951 = vmatpush1.bf16.msra.mxu1 %v1537_v35  ;;  %921 = vmatprep.subr.bf16.mxu0 %v1539_v36  ;;  %v930_v17 = vpack.c.bf16 %v313_v9, %v309_v8  ;;  %v962_v18 = vpack.c.bf16 %v315_v15, %v311_v14  ;;  %v672_v56 = vld [vmem:[%s1725_s4] sm:$0xff]  ;;  %v674_v60 = vld [vmem:[%s1725_s4 + $0x10] sm:$0xff]  ;;  %v675_v0 = vld [vmem:[%s1725_s4 + $0x18] sm:$0xff] }
  0x38   :  { %953 = vmatprep.subr.bf16.mxu1 %v1551_v41  ;;  %v1032_v1 = vpack.c.bf16 %v675_v0, %v674_v60  ;;  %v676_v2 = vld [vmem:[%s1725_s4 + $0x20] sm:$0xff]  ;;  %v679_v8 = vld [vmem:[%s1725_s4 + $0x38] sm:$0xff]  ;;  %v681_v14 = vld [vmem:[%s1725_s4 + $0x48] sm:$0xff] }
  0x3a   :  { %923 = vmatpush1.bf16.msra.mxu0 %v922_v48 }
  0x3b   :  { %955 = vmatpush1.bf16.msra.mxu1 %v954_v52  ;;  %925 = vmatprep.subr.bf16.mxu0 %v924_v53 }
  0x3c   :  { %957 = vmatprep.subr.bf16.mxu1 %v956_v58 }
  0x3e   :  { %927 = vmatpush1.bf16.msra.mxu0 %v926_v4 }
  0x3f   :  { %959 = vmatpush1.bf16.msra.mxu1 %v958_v5  ;;  %929 = vmatprep.subr.bf16.mxu0 %v928_v6 }
  0x40   :  { %961 = vmatprep.subr.bf16.mxu1 %v960_v13 }
  0x42   :  { %931 = vmatpush1.bf16.msra.mxu0 %v930_v17 }
  0x43   :  { %963 = vmatpush1.bf16.msra.mxu1 %v962_v18  ;;  %965 = vmatprep.subr.bf16.mxu0 %v1357_v38 }
  0x44   :  { %997 = vmatprep.subr.bf16.mxu1 %v1368_v42 }
  0x45   :  { %382 = vmatmul.mubr.f32.vlgmr.msra.gmra.mrb[2].mxu0 %v1112_v7 }
  0x46   :  { %453 = vmatmul.mubr.f32.vlgmr.msra.gmra.mrb[2].mxu1 %v1112_v7  ;;  %967 = vmatpush1.bf16.msra.mxu0 %v1388_v49 }
  0x47   :  { %999 = vmatpush1.bf16.msra.mxu1 %v1391_v50  ;;  %969 = vmatprep.subr.bf16.mxu0 %v1393_v51  ;;  %v91_v51 = vlaneseq }
  0x48   :  { %1001 = vmatprep.subr.bf16.mxu1 %v1405_v55  ;;  %551 = vmatprep.mubr.f32.mxu0 %v1112_v7 }
  0x49   :  { %622 = vmatprep.mubr.f32.mxu1 %v1112_v7  ;;  %v92_v55 = vshrl.u32 %v91_v51, 7  ;;  %v687_v51 = vld [vmem:[%s1725_s4 + $0x78] sm:$0xff] }
  0x4a   :  { %971 = vmatpush1.bf16.msra.mxu0 %v1423_v61 }
  0x4b   :  { %1003 = vmatpush1.bf16.msra.mxu1 %v1427_v62  ;;  %973 = vmatprep.subr.bf16.mxu0 %v1429_v63  ;;  %v93_v61 = vsub.s32 0, %v92_v55  ;;  %v89_v62 = vld [vmem:[%s1724_s3] sm:$0xf]  ;;  %v97_v63 = vsub.s32 1, %v92_v55  ;;  %v101_v26 = vsub.s32 2, %v92_v55 }
  0x4c   :  { %1005 = vmatprep.subr.bf16.mxu1 %v1441_v3 }
  0x4d   :  { %v94_v3 = vrot.slane %v89_v62, %v93_v61  ;;  %v102_v30 = vrot.slane %v89_v62, %v101_v26 }
  0x4e   :  { %975 = vmatpush1.bf16.msra.mxu0 %v1461_v10  ;;  %v98_v10 = vrot.slane %v89_v62, %v97_v63 }
  0x4f   :  { %1007 = vmatpush1.bf16.msra.mxu1 %v1465_v11  ;;  %977 = vmatprep.subr.bf16.mxu0 %v1467_v12  ;;  %v105_v11 = vsub.s32 3, %v92_v55 }
  0x50   :  { %1009 = vmatprep.subr.bf16.mxu1 %v1479_v16 }
  0x52   :  { %979 = vmatpush1.bf16.msra.mxu0 %v1497_v22 }
  0x53   :  { %1011 = vmatpush1.bf16.msra.mxu1 %v1501_v23  ;;  %981 = vmatprep.subr.bf16.mxu0 %v1503_v24  ;;  %v106_v23 = vrot.slane %v89_v62, %v105_v11 }
  0x54   :  { %1013 = vmatprep.subr.bf16.mxu1 %v1515_v28 }
  0x56   :  { %983 = vmatpush1.bf16.msra.mxu0 %v1533_v34 }
  0x57   :  { %1015 = vmatpush1.bf16.msra.mxu1 %v1537_v35  ;;  %985 = vmatprep.subr.bf16.mxu0 %v1539_v36 }
  0x58   :  { %1017 = vmatprep.subr.bf16.mxu1 %v1551_v41 }
  0x5a   :  { %987 = vmatpush1.bf16.msra.mxu0 %v922_v48 }
  0x5b   :  { %1019 = vmatpush1.bf16.msra.mxu1 %v954_v52  ;;  %989 = vmatprep.subr.bf16.mxu0 %v924_v53 }
  0x5c   :  { %1021 = vmatprep.subr.bf16.mxu1 %v956_v58  ;;  %v1029_v58 = vpack.c.bf16 %v673_v57, %v672_v56 }
  0x5e   :  { %991 = vmatpush1.bf16.msra.mxu0 %v926_v4  ;;  %v677_v4 = vld [vmem:[%s1725_s4 + $0x28] sm:$0xff] }
  0x5f   :  { %1023 = vmatpush1.bf16.msra.mxu1 %v958_v5  ;;  %993 = vmatprep.subr.bf16.mxu0 %v928_v6  ;;  %v1035_v5 = vpack.c.bf16 %v677_v4, %v676_v2  ;;  %v678_v6 = vld [vmem:[%s1725_s4 + $0x30] sm:$0xff] }
  0x60   :  { %1025 = vmatprep.subr.bf16.mxu1 %v960_v13  ;;  %v1038_v9 = vpack.c.bf16 %v679_v8, %v678_v6  ;;  %v680_v13 = vld [vmem:[%s1725_s4 + $0x40] sm:$0xff] }
  0x61   :  { %v1041_v15 = vpack.c.bf16 %v681_v14, %v680_v13 }
  0x62   :  { %995 = vmatpush1.bf16.msra.mxu0 %v930_v17  ;;  %v682_v17 = vld [vmem:[%s1725_s4 + $0x50] sm:$0xff] }
  0x63   :  { %1027 = vmatpush1.bf16.msra.mxu1 %v962_v18  ;;  %1028 = vmatprep.subr.bf16.mxu0 %v1113_v59  ;;  %v683_v18 = vld [vmem:[%s1725_s4 + $0x58] sm:$0xff] }
  0xf8   :  { %v177_v38 = vpop.f32.mrb[0].mxu0 }
  0xf9   :  { %v179_v42 = vpop.f32.mrb[1].mxu0  ;;  %v248_v49 = vpop.f32.mrb[0].mxu1  ;;  %v1637_v12 = vadd.f32 %v177_v38, %v94_v3  ;;  %v1044_v38 = vpack.c.bf16 %v683_v18, %v682_v17 }
  0xfa   :  { %v250_v50 = vpop.f32.mrb[1].mxu1  ;;  %v1639_v16 = vadd.f32 %v179_v42, %v98_v10  ;;  %v1646_v32 = vadd.f32 %v248_v49, %v102_v30  ;;  %v684_v42 = vld [vmem:[%s1725_s4 + $0x60] sm:$0xff] }
  0xfb   :  { %v1643_v29 = vadd.f32 %v250_v50, %v106_v23  ;;  %v686_v50 = vld [vmem:[%s1725_s4 + $0x70] sm:$0xff] }
  0xfc   :  { %v1050_v55 = vpack.c.bf16 %v687_v51, %v686_v50 }
 0x118   :  { %v383_v19 = vpop.f32.mrb[2].mxu0 }
 0x119   :  { %v459_v20 = vadd.f32 %v383_v19, %v1637_v12  ;;  %v454_v21 = vpop.f32.mrb[2].mxu1  ;;  %v385_v22 = vpop.f32.mrb[3].mxu0 }
 0x11a   :  { %v460_v24 = vadd.f32 %v385_v22, %v1639_v16  ;;  %v456_v25 = vpop.f32.mrb[3].mxu1  ;;  %v461_v34 = vadd.f32 %v454_v21, %v1646_v32 }
 0x11b   :  { %v778_v27 = vmul.f32 -1.442695, %v459_v20  ;;  %v462_v31 = vadd.f32 %v456_v25, %v1643_v29 }
 0x11c   :  { %v779_v28 = vmul.f32 -1.442695, %v460_v24 }
 0x11d   :  { %1056 = vpow2.f32 %v778_v27  ;;  %v780_v33 = vmul.f32 -1.442695, %v462_v31 }
 0x11e   :  { %1058 = vpow2.f32 %v779_v28 }
 0x11f   :  { %1060 = vpow2.f32 %v780_v33 }
 0x120   :  { %1062 = vtanh.f32 %v461_v34 }
 0x127   :  { %v1057_v35 = vpop.eup %1056 }
 0x128   :  { %v1059_v36 = vpop.eup %1058  ;;  %v466_v37 = vadd.f32 1.0, %v1057_v35 }
 0x129   :  { %v472_v39 = vadd.f32 1.0, %v1059_v36  ;;  %v1061_v40 = vpop.eup %1060 }
 0x12a   :  { %1064 = vrcp.f32 %v466_v37  ;;  %v1063_v41 = vpop.eup %1062  ;;  %v479_v46 = vadd.f32 1.0, %v1061_v40 }
 0x12b   :  { %1066 = vrcp.f32 %v472_v39 }
 0x12c   :  { %1068 = vrcp.f32 %v479_v46 }
 0x134   :  { %v1065_v43 = vpop.eup %1064 }
 0x135   :  { %v1067_v44 = vpop.eup %1066  ;;  %v483_v45 = vmul.f32 %v1065_v43, %v1063_v41 }
 0x136   :  { %v482_v47 = vmul.f32 0.0, %v1067_v44  ;;  %v1069_v52 = vpop.eup %1068 }
 0x138   :  { %v1649_v48 = vadd.f32 %v483_v45, %v482_v47  ;;  %v688_v45 = vld [vmem:[%s1726_s5] sm:$0x1] }
 0x13a   :  { %1070 = vtanh.f32 %v1649_v48  ;;  %v665_v35 = vrot.slane %v1649_v48, 7 }
 0x144   :  { %v1071_v53 = vpop.eup %1070 }
 0x145   :  { %v486_v54 = vmul.f32 %v1071_v53, %v1069_v52 }
 0x147   :  { %552 = vmatmul.mubr.f32.vlgmr.msra.gmra.mrb[4].mxu0 %v486_v54  ;;  %623 = vmatmul.mubr.f32.vlgmr.msra.gmra.mrb[4].mxu1 %v486_v54 }
 0x148   :  { %1030 = vmatpush3.bf16.msra.mxu0 %v1029_v58  ;;  %833 = vmatprep.mubr.msk.f32.mxu0 %vm1114_vm0, %v1112_v7  ;;  %v685_v7 = vld [vmem:[%s1725_s4 + $0x68] sm:$0xff] }
 0x149   :  { %1031 = vmatprep.subr.bf16.mxu0 %v1113_v59  ;;  %v1047_v49 = vpack.c.bf16 %v685_v7, %v684_v42 }
 0x14c   :  { %1033 = vmatpush3.bf16.msra.mxu0 %v1032_v1 }
 0x14d   :  { %1034 = vmatprep.subr.bf16.mxu0 %v1113_v59 }
 0x150   :  { %1036 = vmatpush3.bf16.msra.mxu0 %v1035_v5 }
 0x151   :  { %1037 = vmatprep.subr.bf16.mxu0 %v1113_v59 }
 0x154   :  { %1039 = vmatpush3.bf16.msra.mxu0 %v1038_v9 }
 0x155   :  { %1040 = vmatprep.subr.bf16.mxu0 %v1113_v59 }
 0x158   :  { %1042 = vmatpush3.bf16.msra.mxu0 %v1041_v15 }
 0x159   :  { %1043 = vmatprep.subr.bf16.mxu0 %v1113_v59 }
 0x15c   :  { %1045 = vmatpush3.bf16.msra.mxu0 %v1044_v38 }
 0x15d   :  { %1046 = vmatprep.subr.bf16.mxu0 %v1113_v59 }
 0x160   :  { %1048 = vmatpush3.bf16.msra.mxu0 %v1047_v49 }
 0x161   :  { %1049 = vmatprep.subr.bf16.mxu0 %v1113_v59 }
 0x164   :  { %1051 = vmatpush3.bf16.msra.mxu0 %v1050_v55 }
 0x21a   :  { %v553_v61 = vpop.f32.mrb[4].mxu0  ;;  %v624_v62 = vpop.f32.mrb[4].mxu1 }
 0x21b   :  { %v633_v63 = vrot.slane %v553_v61, 7  ;;  %v555_v3 = vpop.f32.mrb[5].mxu0  ;;  %v626_v10 = vpop.f32.mrb[5].mxu1  ;;  %v635_v25 = vrot.slane %v624_v62, 7 }
 0x21c   :  { %v634_v11 = vrot.slane %v555_v3, 7  ;;  %v636_v23 = vrot.slane %v626_v10, 7 }
 0x21d   :  { %v641_v19 = vadd.f32 %v633_v63, %v1637_v12  ;;  %v643_v27 = vadd.f32 %v635_v25, %v1646_v32 }
 0x21e   :  { %v642_v20 = vadd.f32 %v634_v11, %v1639_v16  ;;  %v644_v24 = vadd.f32 %v636_v23, %v1643_v29 }
 0x21f   :  { %v781_v21 = vmul.f32 -1.442695, %v641_v19 }
 0x220   :  { %v782_v22 = vmul.f32 -1.442695, %v642_v20  ;;  %v783_v26 = vmul.f32 -1.442695, %v644_v24 }
 0x221   :  { %1072 = vpow2.f32 %v781_v21 }
 0x222   :  { %1074 = vpow2.f32 %v782_v22 }
 0x223   :  { %1076 = vpow2.f32 %v783_v26 }
 0x224   :  { %1078 = vtanh.f32 %v643_v27 }
 0x22b   :  { %v1073_v28 = vpop.eup %1072 }
 0x22c   :  { %v1075_v30 = vpop.eup %1074  ;;  %v648_v31 = vadd.f32 1.0, %v1073_v28 }
 0x22d   :  { %v654_v33 = vadd.f32 1.0, %v1075_v30  ;;  %v1077_v12 = vpop.eup %1076 }
 0x22e   :  { %1080 = vrcp.f32 %v648_v31  ;;  %v1079_v16 = vpop.eup %1078  ;;  %v661_v29 = vadd.f32 1.0, %v1077_v12 }
 0x22f   :  { %1082 = vrcp.f32 %v654_v33 }
 0x230   :  { %1084 = vrcp.f32 %v661_v29 }
 0x238   :  { %v1081_v34 = vpop.eup %1080 }
 0x239   :  { %v1083_v36 = vpop.eup %1082  ;;  %v668_v37 = vmul.f32 %v1081_v34, %v1079_v16 }
 0x23a   :  { %v667_v39 = vmul.f32 %v1083_v36, %v665_v35  ;;  %v1085_v32 = vpop.eup %1084 }
 0x23c   :  { %v669_v40 = vadd.f32 %v668_v37, %v667_v39 }
 0x23e   :  { %1086 = vtanh.f32 %v669_v40 }
 0x248   :  { %v1087_v41 = vpop.eup %1086 }
 0x249   :  { %v671_v43 = vmul.f32 %v1087_v41, %v1085_v32 }
 0x24b   :  { %v690_v44 = vrot.slane %v671_v43, 1 }
 0x24d   :  { %834 = vmatmul.mubr.f32.vlgmr.msra.gmra.mrb[6].mxu0 %v690_v44 }
 0x320   :  { %v758_v46 = vpop.f32.mrb[6].mxu0 }
 0x321   :  { %v759_v47 = vadd.f32 %v758_v46, %v688_v45  ;;  %v835_v48 = vpop.f32.mrb[7].mxu0 }
 0x323   :  { %763 = vst.msk [vmem:[#allocation2] sm:$0x1] %vm762_vm1, %v759_v47 }
 0x324   :  { %1099 = shalt.err (!%p1096_p4)
}
 0x325   :  { %s1100_s5 = scalar_lea.hbm %s1727_s6, 16 }
 0x326   :  { %p1101_p5 = scmp.ne.s32.totalorder %s1727_s6, %s1100_s5  ;;  %p1104_p6 = scmp.lt.u32.totalorder %s1100_s5, %s1727_s6 }
 0x328   :  { %p1106_p7 = pnand %p1104_p6, %p1101_p5 }
 0x32a   :  { %1109 = shalt.err (!%p1106_p7)
}
 0x32b   :  { %773 = dma.vmem_to_hbm [thread:$0]  %s771_s0, 16, %s1727_s6, [#allocation3]  }
 0x32c   :  { %1110 = dma.done.wait [#allocation3], 16  }
 0x32d   :  { %1111 = vsyncadd [#allocation3], 4294967280 }
 0x32e   :  { %777 = vsyncpa [#allocation3], 1 }

// kernel: seq2seq_forward.2
= control target key start
LH: loop header
LB: loop body
LE: loop exit
PB: predicated region body
PF: predicated region fallthrough
CT: control target
= control target key end

     0   :  { %10 = vsyncpa [#allocation4], 0  ;;  %s2714_s18 = smov [#allocation3]   ;;  %s3364_s0 = inlined_call_operand.vmem [shape: f32[8,8,64], index: 0, kind: input, shape index: {}]   ;;  %s3365_s1 = inlined_call_operand.vmem [shape: s32[8,1], index: 1, kind: input, shape index: {}]   ;;  %s3366_s2 = inlined_call_operand.vmem [shape: f32[64,512], index: 2, kind: input, shape index: {}]   ;;  %s3367_s3 = inlined_call_operand.hbm [shape: f32[128,512], index: 3, kind: input, shape index: {}]   ;;  %s3368_s4 = inlined_call_operand.vmem [shape: f32[1,512], index: 4, kind: input, shape index: {}]   ;;  %s3369_s5 = inlined_call_operand.vmem [shape: f32[8,128], index: 5, kind: output, shape index: {}]  }
   0x1   :  { %s22_s19 = sshll.u32 %s2714_s18, 4  ;;  %s2690_s22 = scalar_lea.hbm %s3367_s3, 8192  ;;  %s23_s19 = int_to_ptr.vmem [resolvable:$true] %s22_s19 }
   0x2   :  { %p2691_p0 = scmp.ne.s32.totalorder %s3367_s3, %s2690_s22  ;;  %p2694_p1 = scmp.lt.u32.totalorder %s2690_s22, %s3367_s3 }
   0x4   :  { %p2696_p2 = pnand %p2694_p1, %p2691_p0 }
   0x6   :  { %2699 = shalt.err (!%p2696_p2)
}
   0x7   :  { %s2700_s27 = scalar_lea.vmem %s23_s19, 8192  ;;  %p2705_p4 = scmp.lt.s32.totalorder %s23_s19, %s23_s19 }
   0x8   :  { %p2701_p3 = scmp.ne.s32.totalorder %s23_s19, %s2700_s27  ;;  %p2706_p5 = scmp.lt.s32.totalorder %s2700_s27, %s2700_s27 }
   0xa   :  { %p2707_p6 = por %p2706_p5, %p2705_p4 }
   0xc   :  { %p2708_p7 = pnand %p2707_p6, %p2701_p3 }
   0xe   :  { %2711 = shalt.err (!%p2708_p7)
}
   0xf   :  { %s2715_s28 = smov 512   ;;  %s2716_s29 = smov 32  }
  0x10   :  { %28 = dma.hbm_to_vmem [thread:$0]  %s3367_s3, 8192, %s23_s19, [#allocation4], %s2715_s28, %s2715_s28, %s2716_s29  }
  0x11   :  { %2712 = dma.done.wait [#allocation4], 8192  }
  0x12   :  { %2713 = vsyncadd [#allocation4], 4294959104  ;;  %v2717_v0 = vmov 0.0   ;;  %v2718_v1 = vmov 0   ;;  %v43_v2 = vld [vmem:[%s3366_s2 + $0x8] sm:$0xff]  ;;  %v45_v4 = vld [vmem:[%s3366_s2 + $0x18] sm:$0xff] }
  0x13   :  { %185 = vmatprep.mubr.f32.mxu0 %v2717_v0  ;;  %298 = vmatprep.mubr.f32.mxu1 %v2717_v0  ;;  %v47_v3 = vld [vmem:[%s3366_s2 + $0x28] sm:$0xff]  ;;  %v49_v6 = vld [vmem:[%s3366_s2 + $0x38] sm:$0xff]  ;;  %v42_v7 = vld [vmem:[%s3366_s2] sm:$0xff]  ;;  %vm96_vm0 = vcmask 523264  }
  0x14   :  { %2560 = vset.pattern.permute.xlu0 %v2718_v1  ;;  %2561 = vset.pattern.permute.xlu1 %v2718_v1  ;;  %v1947_v5 = vpack.c.bf16 %v47_v3, %v43_v2  ;;  %v46_v8 = vld [vmem:[%s3366_s2 + $0x20] sm:$0xff]  ;;  %v1963_v9 = vpack.c.bf16 %v49_v6, %v45_v4  ;;  %v44_v11 = vld [vmem:[%s3366_s2 + $0x10] sm:$0xff]  ;;  %v51_v13 = vld [vmem:[%s3366_s2 + $0x48] sm:$0xff] }
  0x15   :  { %v1949_v10 = vpack.c.bf16 %v46_v8, %v42_v7  ;;  %v48_v12 = vld [vmem:[%s3366_s2 + $0x30] sm:$0xff]  ;;  %v55_v15 = vld [vmem:[%s3366_s2 + $0x68] sm:$0xff]  ;;  %v53_v16 = vld [vmem:[%s3366_s2 + $0x58] sm:$0xff] }
  0x16   :  { %1948 = vmatprep.subr.bf16.mxu0 %v1947_v5  ;;  %v1965_v14 = vpack.c.bf16 %v48_v12, %v44_v11  ;;  %v57_v17 = vld [vmem:[%s3366_s2 + $0x78] sm:$0xff]  ;;  %1964 = vmatprep.subr.bf16.mxu1 %v1963_v9  ;;  %v1951_v18 = vpack.c.bf16 %v55_v15, %v51_v13  ;;  %v50_v20 = vld [vmem:[%s3366_s2 + $0x40] sm:$0xff]  ;;  %v52_v22 = vld [vmem:[%s3366_s2 + $0x50] sm:$0xff] }
  0x17   :  { %1950 = vmatpush1.bf16.msra.mxu0 %v1949_v10  ;;  %v1967_v19 = vpack.c.bf16 %v57_v17, %v53_v16  ;;  %v54_v21 = vld [vmem:[%s3366_s2 + $0x60] sm:$0xff]  ;;  %v56_v24 = vld [vmem:[%s3366_s2 + $0x70] sm:$0xff]  ;;  %v59_v25 = vld [vmem:[%s3366_s2 + $0x88] sm:$0xff] }
  0x18   :  { %1966 = vmatpush1.bf16.msra.mxu1 %v1965_v14  ;;  %v1953_v23 = vpack.c.bf16 %v54_v21, %v50_v20  ;;  %v63_v26 = vld [vmem:[%s3366_s2 + $0xa8] sm:$0xff]  ;;  %1952 = vmatprep.subr.bf16.mxu0 %v1951_v18  ;;  %v1969_v27 = vpack.c.bf16 %v56_v24, %v52_v22  ;;  %v61_v29 = vld [vmem:[%s3366_s2 + $0x98] sm:$0xff]  ;;  %v58_v31 = vld [vmem:[%s3366_s2 + $0x80] sm:$0xff] }
  0x19   :  { %1968 = vmatprep.subr.bf16.mxu1 %v1967_v19  ;;  %v1955_v28 = vpack.c.bf16 %v63_v26, %v59_v25  ;;  %v65_v30 = vld [vmem:[%s3366_s2 + $0xb8] sm:$0xff]  ;;  %v62_v33 = vld [vmem:[%s3366_s2 + $0xa0] sm:$0xff]  ;;  %v60_v34 = vld [vmem:[%s3366_s2 + $0x90] sm:$0xff] }
  0x1a   :  { %v1971_v32 = vpack.c.bf16 %v65_v30, %v61_v29  ;;  %v64_v35 = vld [vmem:[%s3366_s2 + $0xb0] sm:$0xff]  ;;  %v1957_v36 = vpack.c.bf16 %v62_v33, %v58_v31  ;;  %v67_v37 = vld [vmem:[%s3366_s2 + $0xc8] sm:$0xff]  ;;  %v69_v39 = vld [vmem:[%s3366_s2 + $0xd8] sm:$0xff] }
  0x1b   :  { %1954 = vmatpush1.bf16.msra.mxu0 %v1953_v23  ;;  %v71_v38 = vld [vmem:[%s3366_s2 + $0xe8] sm:$0xff]  ;;  %v1973_v40 = vpack.c.bf16 %v64_v35, %v60_v34  ;;  %v73_v42 = vld [vmem:[%s3366_s2 + $0xf8] sm:$0xff]  ;;  %v66_v43 = vld [vmem:[%s3366_s2 + $0xc0] sm:$0xff] }
  0x1c   :  { %1970 = vmatpush1.bf16.msra.mxu1 %v1969_v27  ;;  %1956 = vmatprep.subr.bf16.mxu0 %v1955_v28  ;;  %v1959_v41 = vpack.c.bf16 %v71_v38, %v67_v37  ;;  %v70_v44 = vld [vmem:[%s3366_s2 + $0xe0] sm:$0xff]  ;;  %v1975_v45 = vpack.c.bf16 %v73_v42, %v69_v39  ;;  %v68_v46 = vld [vmem:[%s3366_s2 + $0xd0] sm:$0xff]  ;;  %v386_v48 = vld [vmem:[#allocation3 + $0x8] sm:$0xff] }
  0x1d   :  { %1972 = vmatprep.subr.bf16.mxu1 %v1971_v32  ;;  %v72_v47 = vld [vmem:[%s3366_s2 + $0xf0] sm:$0xff]  ;;  %v390_v49 = vld [vmem:[#allocation3 + $0x28] sm:$0xff]  ;;  %v388_v50 = vld [vmem:[#allocation3 + $0x18] sm:$0xff]  ;;  %v1961_v51 = vpack.c.bf16 %v70_v44, %v66_v43 }
  0x1e   :  { %v392_v52 = vld [vmem:[#allocation3 + $0x38] sm:$0xff]  ;;  %v1977_v53 = vpack.c.bf16 %v72_v47, %v68_v46  ;;  %v2861_v54 = vpack.c.bf16 %v390_v49, %v386_v48  ;;  %v385_v55 = vld [vmem:[#allocation3] sm:$0xff]  ;;  %v387_v58 = vld [vmem:[#allocation3 + $0x10] sm:$0xff] }
  0x1f   :  { %1958 = vmatpush1.bf16.msra.mxu0 %v1957_v36  ;;  %v389_v56 = vld [vmem:[#allocation3 + $0x20] sm:$0xff]  ;;  %v2863_v57 = vpack.c.bf16 %v392_v52, %v388_v50  ;;  %v391_v59 = vld [vmem:[#allocation3 + $0x30] sm:$0xff]  ;;  %v394_v60 = vld [vmem:[#allocation3 + $0x48] sm:$0xff] }
  0x20   :  { %1974 = vmatpush1.bf16.msra.mxu1 %v1973_v40  ;;  %1960 = vmatprep.subr.bf16.mxu0 %v1959_v41  ;;  %v398_v61 = vld [vmem:[#allocation3 + $0x68] sm:$0xff]  ;;  %v34_v62 = vld [vmem:[%s3364_s0] sm:$0xff]  ;;  %v2868_v63 = vpack.c.bf16 %v389_v56, %v385_v55  ;;  %v396_v2 = vld [vmem:[#allocation3 + $0x58] sm:$0xff]  ;;  %v2871_v4 = vpack.c.bf16 %v391_v59, %v387_v58 }
  0x21   :  { %1976 = vmatprep.subr.bf16.mxu1 %v1975_v45  ;;  %v400_v3 = vld [vmem:[#allocation3 + $0x78] sm:$0xff]  ;;  %v393_v5 = vld [vmem:[#allocation3 + $0x40] sm:$0xff]  ;;  %v2874_v7 = vpack.c.bf16 %v398_v61, %v394_v60  ;;  %v395_v8 = vld [vmem:[#allocation3 + $0x50] sm:$0xff] }
  0x22   :  { %v397_v6 = vld [vmem:[#allocation3 + $0x60] sm:$0xff]  ;;  %v399_v9 = vld [vmem:[#allocation3 + $0x70] sm:$0xff]  ;;  %v2877_v10 = vpack.c.bf16 %v400_v3, %v396_v2  ;;  %v402_v11 = vld [vmem:[#allocation3 + $0x88] sm:$0xff] }
  0x23   :  { %1962 = vmatpush1.bf16.msra.mxu0 %v1961_v51  ;;  %v406_v12 = vld [vmem:[#allocation3 + $0xa8] sm:$0xff]  ;;  %v2884_v14 = vpack.c.bf16 %v397_v6, %v393_v5  ;;  %v404_v15 = vld [vmem:[#allocation3 + $0x98] sm:$0xff]  ;;  %v2888_v17 = vpack.c.bf16 %v399_v9, %v395_v8  ;;  %v401_v18 = vld [vmem:[#allocation3 + $0x80] sm:$0xff] }
  0x24   :  { %1978 = vmatpush1.bf16.msra.mxu1 %v1977_v53  ;;  %1980 = vmatprep.subr.bf16.mxu0 %v2861_v54  ;;  %v35_v13 = vld [vmem:[%s3364_s0 + $0x8] sm:$0xff]  ;;  %v408_v16 = vld [vmem:[#allocation3 + $0xb8] sm:$0xff]  ;;  %v405_v19 = vld [vmem:[#allocation3 + $0xa0] sm:$0xff]  ;;  %v2892_v20 = vpack.c.bf16 %v406_v12, %v402_v11 }
  0x25   :  { %2012 = vmatprep.subr.bf16.mxu1 %v2863_v57  ;;  %v403_v21 = vld [vmem:[#allocation3 + $0x90] sm:$0xff]  ;;  %v2896_v23 = vpack.c.bf16 %v408_v16, %v404_v15  ;;  %v410_v24 = vld [vmem:[#allocation3 + $0xc8] sm:$0xff]  ;;  %v2903_v27 = vpack.c.bf16 %v405_v19, %v401_v18  ;;  %v412_v28 = vld [vmem:[#allocation3 + $0xd8] sm:$0xff] }
  0x26   :  { %1906 = vmatmul.mubr.msk.f32.vlgmr.msra.gmra.mrb[0].mxu0 %vm96_vm0, %v34_v62  ;;  %v407_v22 = vld [vmem:[#allocation3 + $0xb0] sm:$0xff]  ;;  %v414_v25 = vld [vmem:[#allocation3 + $0xe8] sm:$0xff]  ;;  %v416_v29 = vld [vmem:[#allocation3 + $0xf8] sm:$0xff] }
  0x27   :  { %1914 = vmatmul.mubr.msk.f32.vlgmr.msra.gmra.mrb[0].mxu1 %vm96_vm0, %v34_v62  ;;  %1982 = vmatpush1.bf16.msra.mxu0 %v2868_v63  ;;  %v36_v26 = vld [vmem:[%s3364_s0 + $0x10] sm:$0xff]  ;;  %v2907_v30 = vpack.c.bf16 %v407_v22, %v403_v21  ;;  %v409_v31 = vld [vmem:[#allocation3 + $0xc0] sm:$0xff]  ;;  %v2911_v33 = vpack.c.bf16 %v414_v25, %v410_v24  ;;  %v2915_v36 = vpack.c.bf16 %v416_v29, %v412_v28  ;;  %v418_v37 = vld [vmem:[#allocation3 + $0x108] sm:$0xff] }
  0x28   :  { %2014 = vmatpush1.bf16.msra.mxu1 %v2871_v4  ;;  %191 = vmatprep.mubr.f32.mxu0 %v2717_v0  ;;  %v413_v32 = vld [vmem:[#allocation3 + $0xe0] sm:$0xff]  ;;  %v411_v34 = vld [vmem:[#allocation3 + $0xd0] sm:$0xff]  ;;  %v422_v38 = vld [vmem:[#allocation3 + $0x128] sm:$0xff] }
  0x29   :  { %304 = vmatprep.mubr.f32.mxu1 %v2717_v0  ;;  %1984 = vmatprep.subr.bf16.mxu0 %v2874_v7  ;;  %v415_v35 = vld [vmem:[#allocation3 + $0xf0] sm:$0xff]  ;;  %v37_v39 = vld [vmem:[%s3364_s0 + $0x18] sm:$0xff]  ;;  %v2922_v40 = vpack.c.bf16 %v413_v32, %v409_v31  ;;  %v417_v44 = vld [vmem:[#allocation3 + $0x100] sm:$0xff]  ;;  %v2930_v46 = vpack.c.bf16 %v422_v38, %v418_v37 }
  0x2a   :  { %1907 = vmatmul.mubr.msk.f32.gmra.mrb[2].mxu0 %vm96_vm0, %v35_v13  ;;  %2016 = vmatprep.subr.bf16.mxu1 %v2877_v10  ;;  %v420_v41 = vld [vmem:[#allocation3 + $0x118] sm:$0xff]  ;;  %v2926_v43 = vpack.c.bf16 %v415_v35, %v411_v34  ;;  %v421_v45 = vld [vmem:[#allocation3 + $0x120] sm:$0xff]  ;;  %v419_v47 = vld [vmem:[#allocation3 + $0x110] sm:$0xff] }
  0x2b   :  { %1915 = vmatmul.mubr.msk.f32.gmra.mrb[2].mxu1 %vm96_vm0, %v35_v13  ;;  %1986 = vmatpush1.bf16.msra.mxu0 %v2884_v14  ;;  %v424_v42 = vld [vmem:[#allocation3 + $0x138] sm:$0xff]  ;;  %v423_v48 = vld [vmem:[#allocation3 + $0x130] sm:$0xff]  ;;  %v426_v50 = vld [vmem:[#allocation3 + $0x148] sm:$0xff]  ;;  %v2941_v53 = vpack.c.bf16 %v421_v45, %v417_v44 }
  0x2c   :  { %2018 = vmatpush1.bf16.msra.mxu1 %v2888_v17  ;;  %197 = vmatprep.mubr.f32.mxu0 %v2717_v0  ;;  %v2934_v49 = vpack.c.bf16 %v424_v42, %v420_v41  ;;  %v430_v51 = vld [vmem:[#allocation3 + $0x168] sm:$0xff]  ;;  %v38_v52 = vld [vmem:[%s3364_s0 + $0x20] sm:$0xff]  ;;  %v428_v55 = vld [vmem:[#allocation3 + $0x158] sm:$0xff]  ;;  %v2945_v58 = vpack.c.bf16 %v423_v48, %v419_v47 }
  0x2d   :  { %310 = vmatprep.mubr.f32.mxu1 %v2717_v0  ;;  %1988 = vmatprep.subr.bf16.mxu0 %v2892_v20  ;;  %v432_v56 = vld [vmem:[#allocation3 + $0x178] sm:$0xff]  ;;  %v425_v59 = vld [vmem:[#allocation3 + $0x140] sm:$0xff]  ;;  %v2949_v61 = vpack.c.bf16 %v430_v51, %v426_v50  ;;  %v427_v62 = vld [vmem:[#allocation3 + $0x150] sm:$0xff] }
  0x2e   :  { %1908 = vmatmul.mubr.msk.f32.gmra.mrb[4].mxu0 %vm96_vm0, %v36_v26  ;;  %2020 = vmatprep.subr.bf16.mxu1 %v2896_v23  ;;  %v429_v60 = vld [vmem:[#allocation3 + $0x160] sm:$0xff]  ;;  %v431_v2 = vld [vmem:[#allocation3 + $0x170] sm:$0xff]  ;;  %v2953_v3 = vpack.c.bf16 %v432_v56, %v428_v55  ;;  %v434_v5 = vld [vmem:[#allocation3 + $0x188] sm:$0xff] }
  0x2f   :  { %1916 = vmatmul.mubr.msk.f32.gmra.mrb[4].mxu1 %vm96_vm0, %v36_v26  ;;  %1990 = vmatpush1.bf16.msra.mxu0 %v2903_v27  ;;  %v438_v6 = vld [vmem:[#allocation3 + $0x1a8] sm:$0xff]  ;;  %v2960_v9 = vpack.c.bf16 %v429_v60, %v425_v59  ;;  %v436_v11 = vld [vmem:[#allocation3 + $0x198] sm:$0xff]  ;;  %v2964_v13 = vpack.c.bf16 %v431_v2, %v427_v62  ;;  %v433_v15 = vld [vmem:[#allocation3 + $0x180] sm:$0xff] }
  0x30   :  { %2022 = vmatpush1.bf16.msra.mxu1 %v2907_v30  ;;  %203 = vmatprep.mubr.f32.mxu0 %v2717_v0  ;;  %v39_v8 = vld [vmem:[%s3364_s0 + $0x28] sm:$0xff]  ;;  %v440_v12 = vld [vmem:[#allocation3 + $0x1b8] sm:$0xff]  ;;  %v437_v16 = vld [vmem:[#allocation3 + $0x1a0] sm:$0xff]  ;;  %v2971_v19 = vpack.c.bf16 %v438_v6, %v434_v5 }
  0x31   :  { %316 = vmatprep.mubr.f32.mxu1 %v2717_v0  ;;  %1992 = vmatprep.subr.bf16.mxu0 %v2911_v33  ;;  %v379_v18 = vld [vmem:[%s3365_s1] sm:$0xff]  ;;  %v435_v21 = vld [vmem:[#allocation3 + $0x190] sm:$0xff]  ;;  %v2975_v24 = vpack.c.bf16 %v440_v12, %v436_v11  ;;  %v442_v25 = vld [vmem:[#allocation3 + $0x1c8] sm:$0xff]  ;;  %v2982_v29 = vpack.c.bf16 %v437_v16, %v433_v15 }
  0x32   :  { %1909 = vmatmul.mubr.msk.f32.gmra.mrb[6].mxu0 %vm96_vm0, %v37_v39  ;;  %2024 = vmatprep.subr.bf16.mxu1 %v2915_v36  ;;  %v439_v22 = vld [vmem:[#allocation3 + $0x1b0] sm:$0xff]  ;;  %v446_v26 = vld [vmem:[#allocation3 + $0x1e8] sm:$0xff]  ;;  %v444_v31 = vld [vmem:[#allocation3 + $0x1d8] sm:$0xff]  ;;  %v2984_v34 = vadd.s32 4294967295, %v379_v18 }
  0x33   :  { %1917 = vmatmul.mubr.msk.f32.gmra.mrb[6].mxu1 %vm96_vm0, %v37_v39  ;;  %1994 = vmatpush1.bf16.msra.mxu0 %v2922_v40  ;;  %v40_v28 = vld [vmem:[%s3364_s0 + $0x30] sm:$0xff]  ;;  %v448_v32 = vld [vmem:[#allocation3 + $0x1f8] sm:$0xff]  ;;  %v2988_v35 = vpack.c.bf16 %v439_v22, %v435_v21  ;;  %v441_v37 = vld [vmem:[#allocation3 + $0x1c0] sm:$0xff]  ;;  %v2992_v39 = vpack.c.bf16 %v446_v26, %v442_v25 }
  0x34   :  { %2026 = vmatpush1.bf16.msra.mxu1 %v2926_v43  ;;  %209 = vmatprep.mubr.f32.mxu0 %v2717_v0  ;;  %v445_v38 = vld [vmem:[#allocation3 + $0x1e0] sm:$0xff]  ;;  %v443_v41 = vld [vmem:[#allocation3 + $0x1d0] sm:$0xff]  ;;  %v2996_v44 = vpack.c.bf16 %v448_v32, %v444_v31  ;;  %v41_v45 = vld [vmem:[%s3364_s0 + $0x38] sm:$0xff]  ;;  %vm619_vm1 = vcmp.eq.s32.totalorder %v2984_v34, 0  ;;  %vm801_vm2 = vcmp.eq.s32.totalorder %v2984_v34, 1  ;;  %vm983_vm3 = vcmp.eq.s32.totalorder %v2984_v34, 2 }
  0x35   :  { %322 = vmatprep.mubr.f32.mxu1 %v2717_v0  ;;  %1996 = vmatprep.subr.bf16.mxu0 %v2930_v46  ;;  %v447_v42 = vld [vmem:[#allocation3 + $0x1f0] sm:$0xff]  ;;  %v3003_v47 = vpack.c.bf16 %v445_v38, %v441_v37  ;;  %v620_v50 = vsel %vm619_vm1, 1, %v2718_v1  ;;  %v802_v51 = vsel %vm801_vm2, 1, %v2718_v1  ;;  %v74_v59 = vld [vmem:[%s3368_s4] sm:$0xf]  ;;  %vm1165_vm6 = vcmp.eq.s32.totalorder %v2984_v34, 3 }
  0x36   :  { %1910 = vmatmul.mubr.msk.f32.gmra.mrb[8].mxu0 %vm96_vm0, %v38_v52  ;;  %2028 = vmatprep.subr.bf16.mxu1 %v2934_v49  ;;  %v3008_v48 = vpack.c.bf16 %v447_v42, %v443_v41  ;;  %vm1347_vm8 = vcmp.eq.s32.totalorder %v2984_v34, 4  ;;  %vm1529_vm10 = vcmp.eq.s32.totalorder %v2984_v34, 5  ;;  %vm1711_vm12 = vcmp.eq.s32.totalorder %v2984_v34, 6 }
  0x37   :  { %1918 = vmatmul.mubr.msk.f32.gmra.mrb[8].mxu1 %vm96_vm0, %v38_v52  ;;  %1998 = vmatpush1.bf16.msra.mxu0 %v2941_v53  ;;  %v76_v52 = vlaneseq  ;;  %vm1893_vm14 = vcmp.eq.s32.totalorder %v2984_v34, 7 }
  0x38   :  { %2030 = vmatpush1.bf16.msra.mxu1 %v2945_v58  ;;  %215 = vmatprep.mubr.f32.mxu0 %v2717_v0 }
  0x39   :  { %328 = vmatprep.mubr.f32.mxu1 %v2717_v0  ;;  %2000 = vmatprep.subr.bf16.mxu0 %v2949_v61  ;;  %v77_v55 = vshrl.u32 %v76_v52, 7 }
  0x3a   :  { %1911 = vmatmul.mubr.msk.f32.gmra.mrb[10].mxu0 %vm96_vm0, %v39_v8  ;;  %2032 = vmatprep.subr.bf16.mxu1 %v2953_v3 }
  0x3b   :  { %1919 = vmatmul.mubr.msk.f32.gmra.mrb[10].mxu1 %vm96_vm0, %v39_v8  ;;  %2002 = vmatpush1.bf16.msra.mxu0 %v2960_v9  ;;  %v78_v56 = vsub.s32 0, %v77_v55  ;;  %v82_v60 = vsub.s32 1, %v77_v55  ;;  %v90_v6 = vsub.s32 3, %v77_v55  ;;  %v86_v25 = vsub.s32 2, %v77_v55 }
  0x3c   :  { %2034 = vmatpush1.bf16.msra.mxu1 %v2964_v13  ;;  %221 = vmatprep.mubr.f32.mxu0 %v2717_v0 }
  0x3d   :  { %334 = vmatprep.mubr.f32.mxu1 %v2717_v0  ;;  %2004 = vmatprep.subr.bf16.mxu0 %v2971_v19  ;;  %v3063_v62 = vrot.slane %v74_v59, %v78_v56  ;;  %v3065_v2 = vrot.slane %v74_v59, %v82_v60  ;;  %v3069_v22 = vrot.slane %v74_v59, %v90_v6 }
  0x3e   :  { %1912 = vmatmul.mubr.msk.f32.gmra.mrb[12].mxu0 %vm96_vm0, %v40_v28  ;;  %2036 = vmatprep.subr.bf16.mxu1 %v2975_v24 }
  0x3f   :  { %1920 = vmatmul.mubr.msk.f32.gmra.mrb[12].mxu1 %vm96_vm0, %v40_v28  ;;  %2006 = vmatpush1.bf16.msra.mxu0 %v2982_v29  ;;  %v3072_v28 = vrot.slane %v74_v59, %v86_v25 }
  0x40   :  { %2038 = vmatpush1.bf16.msra.mxu1 %v2988_v35  ;;  %227 = vmatprep.mubr.f32.mxu0 %v2717_v0 }
  0x41   :  { %340 = vmatprep.mubr.f32.mxu1 %v2717_v0  ;;  %2008 = vmatprep.subr.bf16.mxu0 %v2992_v39 }
  0x42   :  { %1913 = vmatmul.mubr.msk.f32.gmra.mrb[14].mxu0 %vm96_vm0, %v41_v45  ;;  %2040 = vmatprep.subr.bf16.mxu1 %v2996_v44 }
  0x43   :  { %1921 = vmatmul.mubr.msk.f32.gmra.mrb[14].mxu1 %vm96_vm0, %v41_v45  ;;  %2010 = vmatpush1.bf16.msra.mxu0 %v3003_v47 }
  0x44   :  { %2042 = vmatpush1.bf16.msra.mxu1 %v3008_v48  ;;  %513 = vmatprep.mubr.f32.mxu0 %v2717_v0 }
  0x45   :  { %584 = vmatprep.mubr.f32.mxu1 %v2717_v0  ;;  %622 = vperm.xlu0 %2560, %v620_v50  }
  0x46   :  { %514 = vmatmul.mubr.f32.vlgmr.msra.gmra.mrb[0].mxu0 %v2717_v0  ;;  %2044 = vmatprep.subr.bf16.mxu0 %v2861_v54 }
  0x47   :  { %585 = vmatmul.mubr.f32.vlgmr.msra.gmra.mrb[0].mxu1 %v2717_v0  ;;  %2076 = vmatprep.subr.bf16.mxu1 %v2863_v57 }
  0x48   :  { %2046 = vmatpush1.bf16.msra.mxu0 %v2868_v63  ;;  %2078 = vmatpush1.bf16.msra.mxu1 %v2871_v4 }
  0x49   :  { %2048 = vmatprep.subr.bf16.mxu0 %v2874_v7  ;;  %2080 = vmatprep.subr.bf16.mxu1 %v2877_v10 }
  0x4a   :  { %695 = vmatprep.mubr.f32.mxu0 %v2717_v0  ;;  %766 = vmatprep.mubr.f32.mxu1 %v2717_v0 }
  0x4b   :  { %804 = vperm.xlu0 %2560, %v802_v51  }
  0x4c   :  { %2050 = vmatpush1.bf16.msra.mxu0 %v2884_v14  ;;  %2082 = vmatpush1.bf16.msra.mxu1 %v2888_v17 }
  0x4d   :  { %2052 = vmatprep.subr.bf16.mxu0 %v2892_v20  ;;  %2084 = vmatprep.subr.bf16.mxu1 %v2896_v23 }
  0x50   :  { %2054 = vmatpush1.bf16.msra.mxu0 %v2903_v27  ;;  %2086 = vmatpush1.bf16.msra.mxu1 %v2907_v30 }
  0x51   :  { %2056 = vmatprep.subr.bf16.mxu0 %v2911_v33  ;;  %2088 = vmatprep.subr.bf16.mxu1 %v2915_v36 }
  0x54   :  { %2058 = vmatpush1.bf16.msra.mxu0 %v2922_v40  ;;  %2090 = vmatpush1.bf16.msra.mxu1 %v2926_v43 }
  0x55   :  { %2060 = vmatprep.subr.bf16.mxu0 %v2930_v46  ;;  %2092 = vmatprep.subr.bf16.mxu1 %v2934_v49 }
  0x58   :  { %2062 = vmatpush1.bf16.msra.mxu0 %v2941_v53  ;;  %2094 = vmatpush1.bf16.msra.mxu1 %v2945_v58 }
  0x59   :  { %2064 = vmatprep.subr.bf16.mxu0 %v2949_v61  ;;  %2096 = vmatprep.subr.bf16.mxu1 %v2953_v3 }
  0x5c   :  { %2066 = vmatpush1.bf16.msra.mxu0 %v2960_v9  ;;  %2098 = vmatpush1.bf16.msra.mxu1 %v2964_v13 }
  0x5d   :  { %2068 = vmatprep.subr.bf16.mxu0 %v2971_v19  ;;  %2100 = vmatprep.subr.bf16.mxu1 %v2975_v24 }
  0x60   :  { %2070 = vmatpush1.bf16.msra.mxu0 %v2982_v29  ;;  %2102 = vmatpush1.bf16.msra.mxu1 %v2988_v35 }
  0x61   :  { %2072 = vmatprep.subr.bf16.mxu0 %v2992_v39  ;;  %2104 = vmatprep.subr.bf16.mxu1 %v2996_v44 }
  0x64   :  { %2074 = vmatpush1.bf16.msra.mxu0 %v3003_v47  ;;  %2106 = vmatpush1.bf16.msra.mxu1 %v3008_v48 }
  0x65   :  { %2108 = vmatprep.subr.bf16.mxu0 %v2861_v54  ;;  %2140 = vmatprep.subr.bf16.mxu1 %v2863_v57 }
 0x119   :  { %v515_v5 = vpop.f32.mrb[0].mxu0 }
 0x11a   :  { %v2491_v8 = vadd.f32 %v515_v5, %v3063_v62  ;;  %v586_v11 = vpop.f32.mrb[0].mxu1  ;;  %v517_v12 = vpop.f32.mrb[1].mxu0 }
 0x11b   :  { %v2492_v15 = vadd.f32 %v517_v12, %v3065_v2  ;;  %v588_v16 = vpop.f32.mrb[1].mxu1  ;;  %v2507_v32 = vadd.f32 %v586_v11, %v3072_v28  ;;  %v984_v11 = vsel %vm983_vm3, 1, %v2718_v1 }
 0x11c   :  { %v1923_v18 = vmul.f32 -1.442695, %v2491_v8  ;;  %v2508_v26 = vadd.f32 %v588_v16, %v3069_v22  ;;  %986 = vperm.xlu1 %2561, %v984_v11  }
 0x11d   :  { %v1924_v21 = vmul.f32 -1.442695, %v2492_v15 }
 0x11e   :  { %2562 = vpow2.f32 %v1923_v18  ;;  %v1925_v31 = vmul.f32 -1.442695, %v2508_v26 }
 0x11f   :  { %2564 = vpow2.f32 %v1924_v21 }
 0x120   :  { %2566 = vpow2.f32 %v1925_v31 }
 0x121   :  { %2568 = vtanh.f32 %v2507_v32 }
 0x128   :  { %v2563_v37 = vpop.eup %2562 }
 0x129   :  { %v2565_v38 = vpop.eup %2564  ;;  %v598_v41 = vadd.f32 1.0, %v2563_v37 }
 0x12a   :  { %v604_v42 = vadd.f32 1.0, %v2565_v38  ;;  %v2567_v45 = vpop.eup %2566 }
 0x12b   :  { %2570 = vrcp.f32 %v598_v41  ;;  %v2569_v50 = vpop.eup %2568  ;;  %v611_v56 = vadd.f32 1.0, %v2567_v45 }
 0x12c   :  { %2572 = vrcp.f32 %v604_v42 }
 0x12d   :  { %2574 = vrcp.f32 %v611_v56 }
 0x135   :  { %v2571_v51 = vpop.eup %2570 }
 0x136   :  { %v2573_v52 = vpop.eup %2572  ;;  %v615_v55 = vmul.f32 %v2571_v51, %v2569_v50 }
 0x137   :  { %v614_v60 = vmul.f32 0.0, %v2573_v52  ;;  %v2575_v5 = vpop.eup %2574 }
 0x139   :  { %v3075_v59 = vadd.f32 %v615_v55, %v614_v60 }
 0x13b   :  { %2576 = vtanh.f32 %v3075_v59 }
 0x145   :  { %v2577_v6 = vpop.eup %2576 }
 0x146   :  { %v3078_v8 = vmul.f32 %v2577_v6, %v2575_v5 }
 0x148   :  { %696 = vmatmul.mubr.f32.vlgmr.msra.gmra.mrb[2].mxu0 %v3078_v8  ;;  %767 = vmatmul.mubr.f32.vlgmr.msra.gmra.mrb[2].mxu1 %v3078_v8 }
 0x149   :  { %2110 = vmatpush1.bf16.msra.mxu0 %v2868_v63  ;;  %2142 = vmatpush1.bf16.msra.mxu1 %v2871_v4 }
 0x14a   :  { %2112 = vmatprep.subr.bf16.mxu0 %v2874_v7  ;;  %2144 = vmatprep.subr.bf16.mxu1 %v2877_v10 }
 0x14b   :  { %877 = vmatprep.mubr.f32.mxu0 %v2717_v0  ;;  %948 = vmatprep.mubr.f32.mxu1 %v2717_v0 }
 0x14d   :  { %2114 = vmatpush1.bf16.msra.mxu0 %v2884_v14  ;;  %2146 = vmatpush1.bf16.msra.mxu1 %v2888_v17 }
 0x14e   :  { %2116 = vmatprep.subr.bf16.mxu0 %v2892_v20  ;;  %2148 = vmatprep.subr.bf16.mxu1 %v2896_v23 }
 0x151   :  { %2118 = vmatpush1.bf16.msra.mxu0 %v2903_v27  ;;  %2150 = vmatpush1.bf16.msra.mxu1 %v2907_v30 }
 0x152   :  { %2120 = vmatprep.subr.bf16.mxu0 %v2911_v33  ;;  %2152 = vmatprep.subr.bf16.mxu1 %v2915_v36 }
 0x155   :  { %2122 = vmatpush1.bf16.msra.mxu0 %v2922_v40  ;;  %2154 = vmatpush1.bf16.msra.mxu1 %v2926_v43 }
 0x156   :  { %2124 = vmatprep.subr.bf16.mxu0 %v2930_v46  ;;  %2156 = vmatprep.subr.bf16.mxu1 %v2934_v49 }
 0x159   :  { %2126 = vmatpush1.bf16.msra.mxu0 %v2941_v53  ;;  %2158 = vmatpush1.bf16.msra.mxu1 %v2945_v58 }
 0x15a   :  { %2128 = vmatprep.subr.bf16.mxu0 %v2949_v61  ;;  %2160 = vmatprep.subr.bf16.mxu1 %v2953_v3 }
 0x15d   :  { %2130 = vmatpush1.bf16.msra.mxu0 %v2960_v9  ;;  %2162 = vmatpush1.bf16.msra.mxu1 %v2964_v13 }
 0x15e   :  { %2132 = vmatprep.subr.bf16.mxu0 %v2971_v19  ;;  %2164 = vmatprep.subr.bf16.mxu1 %v2975_v24 }
 0x161   :  { %2134 = vmatpush1.bf16.msra.mxu0 %v2982_v29  ;;  %2166 = vmatpush1.bf16.msra.mxu1 %v2988_v35 }
 0x162   :  { %2136 = vmatprep.subr.bf16.mxu0 %v2992_v39  ;;  %2168 = vmatprep.subr.bf16.mxu1 %v2996_v44 }
 0x165   :  { %2138 = vmatpush1.bf16.msra.mxu0 %v3003_v47  ;;  %2170 = vmatpush1.bf16.msra.mxu1 %v3008_v48 }
 0x166   :  { %2172 = vmatprep.subr.bf16.mxu0 %v2861_v54  ;;  %2204 = vmatprep.subr.bf16.mxu1 %v2863_v57 }
 0x21b   :  { %v697_v12 = vpop.f32.mrb[2].mxu0  ;;  %v768_v15 = vpop.f32.mrb[2].mxu1 }
 0x21c   :  { %v2493_v16 = vadd.f32 %v697_v12, %v3063_v62  ;;  %v699_v18 = vpop.f32.mrb[3].mxu0  ;;  %v770_v21 = vpop.f32.mrb[3].mxu1  ;;  %v2509_v38 = vadd.f32 %v768_v15, %v3072_v28 }
 0x21d   :  { %v2494_v25 = vadd.f32 %v699_v18, %v3065_v2  ;;  %v2510_v32 = vadd.f32 %v770_v21, %v3069_v22  ;;  %v623_v12 = vpop.permute.xlu0 %622 }
 0x21e   :  { %v1926_v26 = vmul.f32 -1.442695, %v2493_v16  ;;  %vm624_vm4 = vcmp.eq.s32.totalorder %v623_v12, 1 }
 0x21f   :  { %v1927_v31 = vmul.f32 -1.442695, %v2494_v25  ;;  %v1928_v37 = vmul.f32 -1.442695, %v2510_v32  ;;  %v625_v25 = vsel %vm624_vm4, %v3078_v8, 0.0 }
 0x220   :  { %2578 = vpow2.f32 %v1926_v26 }
 0x221   :  { %2580 = vpow2.f32 %v1927_v31  ;;  %v805_v15 = vpop.permute.xlu0 %804 }
 0x222   :  { %2582 = vpow2.f32 %v1928_v37  ;;  %vm806_vm5 = vcmp.eq.s32.totalorder %v805_v15, 1 }
 0x223   :  { %2584 = vtanh.f32 %v2509_v38 }
 0x22a   :  { %v2579_v41 = vpop.eup %2578 }
 0x22b   :  { %v2581_v42 = vpop.eup %2580  ;;  %v780_v45 = vadd.f32 1.0, %v2579_v41 }
 0x22c   :  { %v786_v50 = vadd.f32 1.0, %v2581_v42  ;;  %v2583_v51 = vpop.eup %2582 }
 0x22d   :  { %2586 = vrcp.f32 %v780_v45  ;;  %v2585_v52 = vpop.eup %2584  ;;  %v793_v5 = vadd.f32 1.0, %v2583_v51 }
 0x22e   :  { %2588 = vrcp.f32 %v786_v50 }
 0x22f   :  { %2590 = vrcp.f32 %v793_v5 }
 0x237   :  { %v2587_v55 = vpop.eup %2586 }
 0x238   :  { %v2589_v56 = vpop.eup %2588  ;;  %v797_v60 = vmul.f32 %v2587_v55, %v2585_v52 }
 0x239   :  { %v796_v6 = vmul.f32 %v2589_v56, %v3075_v59  ;;  %v2591_v16 = vpop.eup %2590  ;;  %v1166_v59 = vsel %vm1165_vm6, 1, %v2718_v1 }
 0x23a   :  { %1168 = vperm.xlu1 %2561, %v1166_v59  }
 0x23b   :  { %v3123_v11 = vadd.f32 %v797_v60, %v796_v6 }
 0x23d   :  { %2592 = vtanh.f32 %v3123_v11 }
 0x247   :  { %v2593_v18 = vpop.eup %2592 }
 0x248   :  { %v800_v21 = vmul.f32 %v2593_v18, %v2591_v16 }
 0x24a   :  { %v3127_v26 = vsel %vm806_vm5, %v800_v21, %v625_v25  ;;  %878 = vmatmul.mubr.f32.vlgmr.msra.gmra.mrb[4].mxu0 %v800_v21  ;;  %949 = vmatmul.mubr.f32.vlgmr.msra.gmra.mrb[4].mxu1 %v800_v21 }
 0x24b   :  { %2174 = vmatpush1.bf16.msra.mxu0 %v2868_v63  ;;  %2206 = vmatpush1.bf16.msra.mxu1 %v2871_v4 }
 0x24c   :  { %2176 = vmatprep.subr.bf16.mxu0 %v2874_v7  ;;  %2208 = vmatprep.subr.bf16.mxu1 %v2877_v10 }
 0x24d   :  { %1059 = vmatprep.mubr.f32.mxu0 %v2717_v0  ;;  %1130 = vmatprep.mubr.f32.mxu1 %v2717_v0 }
 0x24f   :  { %2178 = vmatpush1.bf16.msra.mxu0 %v2884_v14  ;;  %2210 = vmatpush1.bf16.msra.mxu1 %v2888_v17 }
 0x250   :  { %2180 = vmatprep.subr.bf16.mxu0 %v2892_v20  ;;  %2212 = vmatprep.subr.bf16.mxu1 %v2896_v23 }
 0x253   :  { %2182 = vmatpush1.bf16.msra.mxu0 %v2903_v27  ;;  %2214 = vmatpush1.bf16.msra.mxu1 %v2907_v30 }
 0x254   :  { %2184 = vmatprep.subr.bf16.mxu0 %v2911_v33  ;;  %2216 = vmatprep.subr.bf16.mxu1 %v2915_v36 }
 0x257   :  { %2186 = vmatpush1.bf16.msra.mxu0 %v2922_v40  ;;  %2218 = vmatpush1.bf16.msra.mxu1 %v2926_v43 }
 0x258   :  { %2188 = vmatprep.subr.bf16.mxu0 %v2930_v46  ;;  %2220 = vmatprep.subr.bf16.mxu1 %v2934_v49 }
 0x25b   :  { %2190 = vmatpush1.bf16.msra.mxu0 %v2941_v53  ;;  %2222 = vmatpush1.bf16.msra.mxu1 %v2945_v58 }
 0x25c   :  { %2192 = vmatprep.subr.bf16.mxu0 %v2949_v61  ;;  %2224 = vmatprep.subr.bf16.mxu1 %v2953_v3 }
 0x25f   :  { %2194 = vmatpush1.bf16.msra.mxu0 %v2960_v9  ;;  %2226 = vmatpush1.bf16.msra.mxu1 %v2964_v13 }
 0x260   :  { %2196 = vmatprep.subr.bf16.mxu0 %v2971_v19  ;;  %2228 = vmatprep.subr.bf16.mxu1 %v2975_v24 }
 0x263   :  { %2198 = vmatpush1.bf16.msra.mxu0 %v2982_v29  ;;  %2230 = vmatpush1.bf16.msra.mxu1 %v2988_v35 }
 0x264   :  { %2200 = vmatprep.subr.bf16.mxu0 %v2992_v39  ;;  %2232 = vmatprep.subr.bf16.mxu1 %v2996_v44 }
 0x267   :  { %2202 = vmatpush1.bf16.msra.mxu0 %v3003_v47  ;;  %2234 = vmatpush1.bf16.msra.mxu1 %v3008_v48 }
 0x268   :  { %2236 = vmatprep.subr.bf16.mxu0 %v2861_v54  ;;  %2268 = vmatprep.subr.bf16.mxu1 %v2863_v57 }
 0x31d   :  { %v879_v8 = vpop.f32.mrb[4].mxu0  ;;  %v950_v31 = vpop.f32.mrb[4].mxu1 }
 0x31e   :  { %v2495_v32 = vadd.f32 %v879_v8, %v3063_v62  ;;  %v881_v37 = vpop.f32.mrb[5].mxu0  ;;  %v952_v38 = vpop.f32.mrb[5].mxu1  ;;  %v2511_v52 = vadd.f32 %v950_v31, %v3072_v28 }
 0x31f   :  { %v2496_v41 = vadd.f32 %v881_v37, %v3065_v2  ;;  %v2512_v50 = vadd.f32 %v952_v38, %v3069_v22  ;;  %v987_v8 = vpop.permute.xlu1 %986 }
 0x320   :  { %v1929_v42 = vmul.f32 -1.442695, %v2495_v32  ;;  %vm988_vm7 = vcmp.eq.s32.totalorder %v987_v8, 1 }
 0x321   :  { %v1930_v45 = vmul.f32 -1.442695, %v2496_v41  ;;  %v1931_v51 = vmul.f32 -1.442695, %v2512_v50 }
 0x322   :  { %2594 = vpow2.f32 %v1929_v42 }
 0x323   :  { %2596 = vpow2.f32 %v1930_v45 }
 0x324   :  { %2598 = vpow2.f32 %v1931_v51 }
 0x325   :  { %2600 = vtanh.f32 %v2511_v52 }
 0x32c   :  { %v2595_v55 = vpop.eup %2594 }
 0x32d   :  { %v2597_v56 = vpop.eup %2596  ;;  %v962_v60 = vadd.f32 1.0, %v2595_v55 }
 0x32e   :  { %v968_v5 = vadd.f32 1.0, %v2597_v56  ;;  %v2599_v6 = vpop.eup %2598 }
 0x32f   :  { %2602 = vrcp.f32 %v962_v60  ;;  %v2601_v12 = vpop.eup %2600  ;;  %v975_v21 = vadd.f32 1.0, %v2599_v6 }
 0x330   :  { %2604 = vrcp.f32 %v968_v5 }
 0x331   :  { %2606 = vrcp.f32 %v975_v21 }
 0x339   :  { %v2603_v15 = vpop.eup %2602 }
 0x33a   :  { %v2605_v16 = vpop.eup %2604  ;;  %v979_v18 = vmul.f32 %v2603_v15, %v2601_v12 }
 0x33b   :  { %v978_v25 = vmul.f32 %v2605_v16, %v3123_v11  ;;  %v2607_v31 = vpop.eup %2606  ;;  %v1348_v11 = vsel %vm1347_vm8, 1, %v2718_v1 }
 0x33c   :  { %1350 = vperm.xlu0 %2560, %v1348_v11  }
 0x33d   :  { %v3170_v59 = vadd.f32 %v979_v18, %v978_v25 }
 0x33f   :  { %2608 = vtanh.f32 %v3170_v59 }
 0x349   :  { %v2609_v32 = vpop.eup %2608 }
 0x34a   :  { %v982_v37 = vmul.f32 %v2609_v32, %v2607_v31 }
 0x34c   :  { %v3174_v38 = vsel %vm988_vm7, %v982_v37, %v3127_v26  ;;  %1060 = vmatmul.mubr.f32.vlgmr.msra.gmra.mrb[6].mxu0 %v982_v37  ;;  %1131 = vmatmul.mubr.f32.vlgmr.msra.gmra.mrb[6].mxu1 %v982_v37 }
 0x34d   :  { %2238 = vmatpush1.bf16.msra.mxu0 %v2868_v63  ;;  %2270 = vmatpush1.bf16.msra.mxu1 %v2871_v4 }
 0x34e   :  { %2240 = vmatprep.subr.bf16.mxu0 %v2874_v7  ;;  %2272 = vmatprep.subr.bf16.mxu1 %v2877_v10 }
 0x34f   :  { %1241 = vmatprep.mubr.f32.mxu0 %v2717_v0  ;;  %1312 = vmatprep.mubr.f32.mxu1 %v2717_v0 }
 0x351   :  { %2242 = vmatpush1.bf16.msra.mxu0 %v2884_v14  ;;  %2274 = vmatpush1.bf16.msra.mxu1 %v2888_v17 }
 0x352   :  { %2244 = vmatprep.subr.bf16.mxu0 %v2892_v20  ;;  %2276 = vmatprep.subr.bf16.mxu1 %v2896_v23 }
 0x355   :  { %2246 = vmatpush1.bf16.msra.mxu0 %v2903_v27  ;;  %2278 = vmatpush1.bf16.msra.mxu1 %v2907_v30 }
 0x356   :  { %2248 = vmatprep.subr.bf16.mxu0 %v2911_v33  ;;  %2280 = vmatprep.subr.bf16.mxu1 %v2915_v36 }
 0x359   :  { %2250 = vmatpush1.bf16.msra.mxu0 %v2922_v40  ;;  %2282 = vmatpush1.bf16.msra.mxu1 %v2926_v43 }
 0x35a   :  { %2252 = vmatprep.subr.bf16.mxu0 %v2930_v46  ;;  %2284 = vmatprep.subr.bf16.mxu1 %v2934_v49 }
 0x35d   :  { %2254 = vmatpush1.bf16.msra.mxu0 %v2941_v53  ;;  %2286 = vmatpush1.bf16.msra.mxu1 %v2945_v58 }
 0x35e   :  { %2256 = vmatprep.subr.bf16.mxu0 %v2949_v61  ;;  %2288 = vmatprep.subr.bf16.mxu1 %v2953_v3 }
 0x361   :  { %2258 = vmatpush1.bf16.msra.mxu0 %v2960_v9  ;;  %2290 = vmatpush1.bf16.msra.mxu1 %v2964_v13 }
 0x362   :  { %2260 = vmatprep.subr.bf16.mxu0 %v2971_v19  ;;  %2292 = vmatprep.subr.bf16.mxu1 %v2975_v24 }
 0x365   :  { %2262 = vmatpush1.bf16.msra.mxu0 %v2982_v29  ;;  %2294 = vmatpush1.bf16.msra.mxu1 %v2988_v35 }
 0x366   :  { %2264 = vmatprep.subr.bf16.mxu0 %v2992_v39  ;;  %2296 = vmatprep.subr.bf16.mxu1 %v2996_v44 }
 0x369   :  { %2266 = vmatpush1.bf16.msra.mxu0 %v3003_v47  ;;  %2298 = vmatpush1.bf16.msra.mxu1 %v3008_v48 }
 0x36a   :  { %2300 = vmatprep.subr.bf16.mxu0 %v2861_v54  ;;  %2332 = vmatprep.subr.bf16.mxu1 %v2863_v57 }
 0x41f   :  { %v1061_v26 = vpop.f32.mrb[6].mxu0  ;;  %v1132_v41 = vpop.f32.mrb[6].mxu1 }
 0x420   :  { %v2497_v42 = vadd.f32 %v1061_v26, %v3063_v62  ;;  %v1063_v45 = vpop.f32.mrb[7].mxu0  ;;  %v1134_v50 = vpop.f32.mrb[7].mxu1  ;;  %v2513_v5 = vadd.f32 %v1132_v41, %v3072_v28 }
 0x421   :  { %v2498_v51 = vadd.f32 %v1063_v45, %v3065_v2  ;;  %v2514_v56 = vadd.f32 %v1134_v50, %v3069_v22  ;;  %v1169_v26 = vpop.permute.xlu1 %1168 }
 0x422   :  { %v1932_v52 = vmul.f32 -1.442695, %v2497_v42  ;;  %vm1170_vm9 = vcmp.eq.s32.totalorder %v1169_v26, 1 }
 0x423   :  { %v1933_v55 = vmul.f32 -1.442695, %v2498_v51  ;;  %v1934_v60 = vmul.f32 -1.442695, %v2514_v56 }
 0x424   :  { %2610 = vpow2.f32 %v1932_v52 }
 0x425   :  { %2612 = vpow2.f32 %v1933_v55 }
 0x426   :  { %2614 = vpow2.f32 %v1934_v60 }
 0x427   :  { %2616 = vtanh.f32 %v2513_v5 }
 0x42e   :  { %v2611_v6 = vpop.eup %2610 }
 0x42f   :  { %v2613_v12 = vpop.eup %2612  ;;  %v1144_v15 = vadd.f32 1.0, %v2611_v6 }
 0x430   :  { %v1150_v16 = vadd.f32 1.0, %v2613_v12  ;;  %v2615_v18 = vpop.eup %2614 }
 0x431   :  { %2618 = vrcp.f32 %v1144_v15  ;;  %v2617_v21 = vpop.eup %2616  ;;  %v1157_v32 = vadd.f32 1.0, %v2615_v18 }
 0x432   :  { %2620 = vrcp.f32 %v1150_v16 }
 0x433   :  { %2622 = vrcp.f32 %v1157_v32 }
 0x43b   :  { %v2619_v25 = vpop.eup %2618 }
 0x43c   :  { %v2621_v8 = vpop.eup %2620  ;;  %v1161_v31 = vmul.f32 %v2619_v25, %v2617_v21 }
 0x43d   :  { %v1160_v37 = vmul.f32 %v2621_v8, %v3170_v59  ;;  %v2623_v41 = vpop.eup %2622  ;;  %v1530_v59 = vsel %vm1529_vm10, 1, %v2718_v1 }
 0x43e   :  { %1532 = vperm.xlu1 %2561, %v1530_v59  }
 0x43f   :  { %v3217_v11 = vadd.f32 %v1161_v31, %v1160_v37 }
 0x441   :  { %2624 = vtanh.f32 %v3217_v11 }
 0x44b   :  { %v2625_v42 = vpop.eup %2624 }
 0x44c   :  { %v1164_v45 = vmul.f32 %v2625_v42, %v2623_v41 }
 0x44e   :  { %v3221_v50 = vsel %vm1170_vm9, %v1164_v45, %v3174_v38  ;;  %1242 = vmatmul.mubr.f32.vlgmr.msra.gmra.mrb[8].mxu0 %v1164_v45  ;;  %1313 = vmatmul.mubr.f32.vlgmr.msra.gmra.mrb[8].mxu1 %v1164_v45 }
 0x44f   :  { %2302 = vmatpush1.bf16.msra.mxu0 %v2868_v63  ;;  %2334 = vmatpush1.bf16.msra.mxu1 %v2871_v4 }
 0x450   :  { %2304 = vmatprep.subr.bf16.mxu0 %v2874_v7  ;;  %2336 = vmatprep.subr.bf16.mxu1 %v2877_v10 }
 0x451   :  { %1423 = vmatprep.mubr.f32.mxu0 %v2717_v0  ;;  %1494 = vmatprep.mubr.f32.mxu1 %v2717_v0 }
 0x453   :  { %2306 = vmatpush1.bf16.msra.mxu0 %v2884_v14  ;;  %2338 = vmatpush1.bf16.msra.mxu1 %v2888_v17 }
 0x454   :  { %2308 = vmatprep.subr.bf16.mxu0 %v2892_v20  ;;  %2340 = vmatprep.subr.bf16.mxu1 %v2896_v23 }
 0x457   :  { %2310 = vmatpush1.bf16.msra.mxu0 %v2903_v27  ;;  %2342 = vmatpush1.bf16.msra.mxu1 %v2907_v30 }
 0x458   :  { %2312 = vmatprep.subr.bf16.mxu0 %v2911_v33  ;;  %2344 = vmatprep.subr.bf16.mxu1 %v2915_v36 }
 0x45b   :  { %2314 = vmatpush1.bf16.msra.mxu0 %v2922_v40  ;;  %2346 = vmatpush1.bf16.msra.mxu1 %v2926_v43 }
 0x45c   :  { %2316 = vmatprep.subr.bf16.mxu0 %v2930_v46  ;;  %2348 = vmatprep.subr.bf16.mxu1 %v2934_v49 }
 0x45f   :  { %2318 = vmatpush1.bf16.msra.mxu0 %v2941_v53  ;;  %2350 = vmatpush1.bf16.msra.mxu1 %v2945_v58 }
 0x460   :  { %2320 = vmatprep.subr.bf16.mxu0 %v2949_v61  ;;  %2352 = vmatprep.subr.bf16.mxu1 %v2953_v3 }
 0x463   :  { %2322 = vmatpush1.bf16.msra.mxu0 %v2960_v9  ;;  %2354 = vmatpush1.bf16.msra.mxu1 %v2964_v13 }
 0x464   :  { %2324 = vmatprep.subr.bf16.mxu0 %v2971_v19  ;;  %2356 = vmatprep.subr.bf16.mxu1 %v2975_v24 }
 0x467   :  { %2326 = vmatpush1.bf16.msra.mxu0 %v2982_v29  ;;  %2358 = vmatpush1.bf16.msra.mxu1 %v2988_v35 }
 0x468   :  { %2328 = vmatprep.subr.bf16.mxu0 %v2992_v39  ;;  %2360 = vmatprep.subr.bf16.mxu1 %v2996_v44 }
 0x46b   :  { %2330 = vmatpush1.bf16.msra.mxu0 %v3003_v47  ;;  %2362 = vmatpush1.bf16.msra.mxu1 %v3008_v48 }
 0x46c   :  { %2364 = vmatprep.subr.bf16.mxu0 %v2861_v54  ;;  %2396 = vmatprep.subr.bf16.mxu1 %v2863_v57 }
 0x521   :  { %v1243_v38 = vpop.f32.mrb[8].mxu0  ;;  %v1314_v51 = vpop.f32.mrb[8].mxu1 }
 0x522   :  { %v2499_v52 = vadd.f32 %v1243_v38, %v3063_v62  ;;  %v1245_v55 = vpop.f32.mrb[9].mxu0  ;;  %v1316_v56 = vpop.f32.mrb[9].mxu1  ;;  %v2515_v16 = vadd.f32 %v1314_v51, %v3072_v28 }
 0x523   :  { %v2500_v60 = vadd.f32 %v1245_v55, %v3065_v2  ;;  %v2516_v12 = vadd.f32 %v1316_v56, %v3069_v22  ;;  %v1351_v38 = vpop.permute.xlu0 %1350 }
 0x524   :  { %v1935_v5 = vmul.f32 -1.442695, %v2499_v52  ;;  %vm1352_vm11 = vcmp.eq.s32.totalorder %v1351_v38, 1 }
 0x525   :  { %v1936_v6 = vmul.f32 -1.442695, %v2500_v60  ;;  %v1937_v15 = vmul.f32 -1.442695, %v2516_v12 }
 0x526   :  { %2626 = vpow2.f32 %v1935_v5 }
 0x527   :  { %2628 = vpow2.f32 %v1936_v6 }
 0x528   :  { %2630 = vpow2.f32 %v1937_v15 }
 0x529   :  { %2632 = vtanh.f32 %v2515_v16 }
 0x530   :  { %v2627_v18 = vpop.eup %2626 }
 0x531   :  { %v2629_v21 = vpop.eup %2628  ;;  %v1326_v25 = vadd.f32 1.0, %v2627_v18 }
 0x532   :  { %v1332_v8 = vadd.f32 1.0, %v2629_v21  ;;  %v2631_v31 = vpop.eup %2630 }
 0x533   :  { %2634 = vrcp.f32 %v1326_v25  ;;  %v2633_v32 = vpop.eup %2632  ;;  %v1339_v42 = vadd.f32 1.0, %v2631_v31 }
 0x534   :  { %2636 = vrcp.f32 %v1332_v8 }
 0x535   :  { %2638 = vrcp.f32 %v1339_v42 }
 0x53d   :  { %v2635_v37 = vpop.eup %2634 }
 0x53e   :  { %v2637_v26 = vpop.eup %2636  ;;  %v1343_v41 = vmul.f32 %v2635_v37, %v2633_v32 }
 0x53f   :  { %v1342_v45 = vmul.f32 %v2637_v26, %v3217_v11  ;;  %v2639_v51 = vpop.eup %2638  ;;  %v1712_v11 = vsel %vm1711_vm12, 1, %v2718_v1 }
 0x540   :  { %1714 = vperm.xlu0 %2560, %v1712_v11  }
 0x541   :  { %v3264_v59 = vadd.f32 %v1343_v41, %v1342_v45 }
 0x543   :  { %2640 = vtanh.f32 %v3264_v59 }
 0x54d   :  { %v2641_v52 = vpop.eup %2640 }
 0x54e   :  { %v1346_v55 = vmul.f32 %v2641_v52, %v2639_v51 }
 0x550   :  { %v3268_v56 = vsel %vm1352_vm11, %v1346_v55, %v3221_v50  ;;  %1424 = vmatmul.mubr.f32.vlgmr.msra.gmra.mrb[10].mxu0 %v1346_v55  ;;  %1495 = vmatmul.mubr.f32.vlgmr.msra.gmra.mrb[10].mxu1 %v1346_v55  ;;  %v1533_v55 = vpop.permute.xlu1 %1532 }
 0x551   :  { %2366 = vmatpush1.bf16.msra.mxu0 %v2868_v63  ;;  %2398 = vmatpush1.bf16.msra.mxu1 %v2871_v4  ;;  %vm1534_vm13 = vcmp.eq.s32.totalorder %v1533_v55, 1 }
 0x552   :  { %2368 = vmatprep.subr.bf16.mxu0 %v2874_v7  ;;  %2400 = vmatprep.subr.bf16.mxu1 %v2877_v10 }
 0x553   :  { %1605 = vmatprep.mubr.f32.mxu0 %v2717_v0  ;;  %1676 = vmatprep.mubr.f32.mxu1 %v2717_v0 }
 0x555   :  { %2370 = vmatpush1.bf16.msra.mxu0 %v2884_v14  ;;  %2402 = vmatpush1.bf16.msra.mxu1 %v2888_v17 }
 0x556   :  { %2372 = vmatprep.subr.bf16.mxu0 %v2892_v20  ;;  %2404 = vmatprep.subr.bf16.mxu1 %v2896_v23 }
 0x559   :  { %2374 = vmatpush1.bf16.msra.mxu0 %v2903_v27  ;;  %2406 = vmatpush1.bf16.msra.mxu1 %v2907_v30 }
 0x55a   :  { %2376 = vmatprep.subr.bf16.mxu0 %v2911_v33  ;;  %2408 = vmatprep.subr.bf16.mxu1 %v2915_v36 }
 0x55d   :  { %2378 = vmatpush1.bf16.msra.mxu0 %v2922_v40  ;;  %2410 = vmatpush1.bf16.msra.mxu1 %v2926_v43 }
 0x55e   :  { %2380 = vmatprep.subr.bf16.mxu0 %v2930_v46  ;;  %2412 = vmatprep.subr.bf16.mxu1 %v2934_v49 }
 0x561   :  { %2382 = vmatpush1.bf16.msra.mxu0 %v2941_v53  ;;  %2414 = vmatpush1.bf16.msra.mxu1 %v2945_v58 }
 0x562   :  { %2384 = vmatprep.subr.bf16.mxu0 %v2949_v61  ;;  %2416 = vmatprep.subr.bf16.mxu1 %v2953_v3 }
 0x565   :  { %2386 = vmatpush1.bf16.msra.mxu0 %v2960_v9  ;;  %2418 = vmatpush1.bf16.msra.mxu1 %v2964_v13 }
 0x566   :  { %2388 = vmatprep.subr.bf16.mxu0 %v2971_v19  ;;  %2420 = vmatprep.subr.bf16.mxu1 %v2975_v24 }
 0x569   :  { %2390 = vmatpush1.bf16.msra.mxu0 %v2982_v29  ;;  %2422 = vmatpush1.bf16.msra.mxu1 %v2988_v35 }
 0x56a   :  { %2392 = vmatprep.subr.bf16.mxu0 %v2992_v39  ;;  %2424 = vmatprep.subr.bf16.mxu1 %v2996_v44 }
 0x56d   :  { %2394 = vmatpush1.bf16.msra.mxu0 %v3003_v47  ;;  %2426 = vmatpush1.bf16.msra.mxu1 %v3008_v48 }
 0x56e   :  { %2428 = vmatprep.subr.bf16.mxu0 %v2861_v54  ;;  %2460 = vmatprep.subr.bf16.mxu1 %v2863_v57 }
 0x623   :  { %v1425_v50 = vpop.f32.mrb[10].mxu0  ;;  %v1496_v60 = vpop.f32.mrb[10].mxu1 }
 0x624   :  { %v2501_v5 = vadd.f32 %v1425_v50, %v3063_v62  ;;  %v1427_v6 = vpop.f32.mrb[11].mxu0  ;;  %v1498_v12 = vpop.f32.mrb[11].mxu1  ;;  %v2517_v21 = vadd.f32 %v1496_v60, %v3072_v28 }
 0x625   :  { %v2502_v15 = vadd.f32 %v1427_v6, %v3065_v2  ;;  %v2518_v54 = vadd.f32 %v1498_v12, %v3069_v22 }
 0x626   :  { %v1938_v16 = vmul.f32 -1.442695, %v2501_v5 }
 0x627   :  { %v1939_v18 = vmul.f32 -1.442695, %v2502_v15  ;;  %v1940_v57 = vmul.f32 -1.442695, %v2518_v54 }
 0x628   :  { %2642 = vpow2.f32 %v1938_v16 }
 0x629   :  { %2644 = vpow2.f32 %v1939_v18 }
 0x62a   :  { %2646 = vpow2.f32 %v1940_v57 }
 0x62b   :  { %2648 = vtanh.f32 %v2517_v21 }
 0x632   :  { %v2643_v25 = vpop.eup %2642 }
 0x633   :  { %v2645_v8 = vpop.eup %2644  ;;  %v1508_v31 = vadd.f32 1.0, %v2643_v25 }
 0x634   :  { %v1514_v32 = vadd.f32 1.0, %v2645_v8  ;;  %v2647_v37 = vpop.eup %2646 }
 0x635   :  { %2650 = vrcp.f32 %v1508_v31  ;;  %v2649_v26 = vpop.eup %2648  ;;  %v1521_v38 = vadd.f32 1.0, %v2647_v37 }
 0x636   :  { %2652 = vrcp.f32 %v1514_v32 }
 0x637   :  { %2654 = vrcp.f32 %v1521_v38 }
 0x63f   :  { %v2651_v41 = vpop.eup %2650 }
 0x640   :  { %v2653_v42 = vpop.eup %2652  ;;  %v1525_v45 = vmul.f32 %v2651_v41, %v2649_v26 }
 0x641   :  { %v1524_v51 = vmul.f32 %v2653_v42, %v3264_v59  ;;  %v2655_v11 = vpop.eup %2654 }
 0x643   :  { %v3311_v52 = vadd.f32 %v1525_v45, %v1524_v51 }
 0x645   :  { %2656 = vtanh.f32 %v3311_v52 }
 0x64f   :  { %v2657_v50 = vpop.eup %2656 }
 0x650   :  { %v1528_v60 = vmul.f32 %v2657_v50, %v2655_v11 }
 0x652   :  { %v3315_v5 = vsel %vm1534_vm13, %v1528_v60, %v3268_v56  ;;  %1606 = vmatmul.mubr.f32.vlgmr.msra.gmra.mrb[12].mxu0 %v1528_v60  ;;  %1677 = vmatmul.mubr.f32.vlgmr.msra.gmra.mrb[12].mxu1 %v1528_v60 }
 0x653   :  { %2430 = vmatpush1.bf16.msra.mxu0 %v2868_v63  ;;  %2462 = vmatpush1.bf16.msra.mxu1 %v2871_v4 }
 0x654   :  { %2432 = vmatprep.subr.bf16.mxu0 %v2874_v7  ;;  %2464 = vmatprep.subr.bf16.mxu1 %v2877_v10 }
 0x655   :  { %1787 = vmatprep.mubr.f32.mxu0 %v2717_v0  ;;  %1858 = vmatprep.mubr.f32.mxu1 %v2717_v0  ;;  %v1894_v0 = vsel %vm1893_vm14, 1, %v2718_v1 }
 0x656   :  { %1896 = vperm.xlu1 %2561, %v1894_v0  }
 0x657   :  { %2434 = vmatpush1.bf16.msra.mxu0 %v2884_v14  ;;  %2466 = vmatpush1.bf16.msra.mxu1 %v2888_v17 }
 0x658   :  { %2436 = vmatprep.subr.bf16.mxu0 %v2892_v20  ;;  %2468 = vmatprep.subr.bf16.mxu1 %v2896_v23 }
 0x65b   :  { %2438 = vmatpush1.bf16.msra.mxu0 %v2903_v27  ;;  %2470 = vmatpush1.bf16.msra.mxu1 %v2907_v30 }
 0x65c   :  { %2440 = vmatprep.subr.bf16.mxu0 %v2911_v33  ;;  %2472 = vmatprep.subr.bf16.mxu1 %v2915_v36 }
 0x65f   :  { %2442 = vmatpush1.bf16.msra.mxu0 %v2922_v40  ;;  %2474 = vmatpush1.bf16.msra.mxu1 %v2926_v43 }
 0x660   :  { %2444 = vmatprep.subr.bf16.mxu0 %v2930_v46  ;;  %2476 = vmatprep.subr.bf16.mxu1 %v2934_v49 }
 0x663   :  { %2446 = vmatpush1.bf16.msra.mxu0 %v2941_v53  ;;  %2478 = vmatpush1.bf16.msra.mxu1 %v2945_v58 }
 0x664   :  { %2448 = vmatprep.subr.bf16.mxu0 %v2949_v61  ;;  %2480 = vmatprep.subr.bf16.mxu1 %v2953_v3 }
 0x667   :  { %2450 = vmatpush1.bf16.msra.mxu0 %v2960_v9  ;;  %2482 = vmatpush1.bf16.msra.mxu1 %v2964_v13 }
 0x668   :  { %2452 = vmatprep.subr.bf16.mxu0 %v2971_v19  ;;  %2484 = vmatprep.subr.bf16.mxu1 %v2975_v24  ;;  %v1715_v19 = vpop.permute.xlu0 %1714 }
 0x669   :  { %vm1716_vm15 = vcmp.eq.s32.totalorder %v1715_v19, 1 }
 0x66b   :  { %2454 = vmatpush1.bf16.msra.mxu0 %v2982_v29  ;;  %2486 = vmatpush1.bf16.msra.mxu1 %v2988_v35 }
 0x66c   :  { %2456 = vmatprep.subr.bf16.mxu0 %v2992_v39  ;;  %2488 = vmatprep.subr.bf16.mxu1 %v2996_v44 }
 0x66f   :  { %2458 = vmatpush1.bf16.msra.mxu0 %v3003_v47  ;;  %2490 = vmatpush1.bf16.msra.mxu1 %v3008_v48 }
 0x725   :  { %v1607_v63 = vpop.f32.mrb[12].mxu0  ;;  %v1678_v4 = vpop.f32.mrb[12].mxu1 }
 0x726   :  { %v2503_v7 = vadd.f32 %v1607_v63, %v3063_v62  ;;  %v1609_v10 = vpop.f32.mrb[13].mxu0  ;;  %v1680_v14 = vpop.f32.mrb[13].mxu1  ;;  %v2519_v33 = vadd.f32 %v1678_v4, %v3072_v28 }
 0x727   :  { %v2504_v17 = vadd.f32 %v1609_v10, %v3065_v2  ;;  %v2520_v27 = vadd.f32 %v1680_v14, %v3069_v22 }
 0x728   :  { %v1941_v20 = vmul.f32 -1.442695, %v2503_v7 }
 0x729   :  { %v1942_v23 = vmul.f32 -1.442695, %v2504_v17  ;;  %v1943_v30 = vmul.f32 -1.442695, %v2520_v27 }
 0x72a   :  { %2658 = vpow2.f32 %v1941_v20 }
 0x72b   :  { %2660 = vpow2.f32 %v1942_v23 }
 0x72c   :  { %2662 = vpow2.f32 %v1943_v30 }
 0x72d   :  { %2664 = vtanh.f32 %v2519_v33 }
 0x734   :  { %v2659_v36 = vpop.eup %2658 }
 0x735   :  { %v2661_v1 = vpop.eup %2660  ;;  %v1690_v40 = vadd.f32 1.0, %v2659_v36 }
 0x736   :  { %v1696_v43 = vadd.f32 1.0, %v2661_v1  ;;  %v2663_v46 = vpop.eup %2662 }
 0x737   :  { %2666 = vrcp.f32 %v1690_v40  ;;  %v2665_v49 = vpop.eup %2664  ;;  %v1703_v3 = vadd.f32 1.0, %v2663_v46 }
 0x738   :  { %2668 = vrcp.f32 %v1696_v43 }
 0x739   :  { %2670 = vrcp.f32 %v1703_v3 }
 0x741   :  { %v2667_v53 = vpop.eup %2666 }
 0x742   :  { %v2669_v58 = vpop.eup %2668  ;;  %v1707_v61 = vmul.f32 %v2667_v53, %v2665_v49 }
 0x743   :  { %v1706_v9 = vmul.f32 %v2669_v58, %v3311_v52  ;;  %v2671_v24 = vpop.eup %2670 }
 0x745   :  { %v1708_v13 = vadd.f32 %v1707_v61, %v1706_v9 }
 0x747   :  { %2672 = vtanh.f32 %v1708_v13 }
 0x751   :  { %v2673_v29 = vpop.eup %2672 }
 0x752   :  { %v1710_v34 = vmul.f32 %v2673_v29, %v2671_v24 }
 0x754   :  { %v1717_v35 = vsel %vm1716_vm15, %v1710_v34, %v3315_v5  ;;  %1788 = vmatmul.mubr.f32.vlgmr.msra.gmra.mrb[14].mxu0 %v1710_v34  ;;  %1859 = vmatmul.mubr.f32.vlgmr.msra.gmra.mrb[14].mxu1 %v1710_v34 }
 0x827   :  { %v1789_v39 = vpop.f32.mrb[14].mxu0  ;;  %v1860_v44 = vpop.f32.mrb[14].mxu1 }
 0x828   :  { %v2505_v47 = vadd.f32 %v1789_v39, %v3063_v62  ;;  %v1791_v48 = vpop.f32.mrb[15].mxu0  ;;  %v1862_v59 = vpop.f32.mrb[15].mxu1  ;;  %v2521_v18 = vadd.f32 %v1860_v44, %v3072_v28 }
 0x829   :  { %v2506_v56 = vadd.f32 %v1791_v48, %v3065_v2  ;;  %v2522_v15 = vadd.f32 %v1862_v59, %v3069_v22  ;;  %v1897_v28 = vpop.permute.xlu1 %1896 }
 0x82a   :  { %v1944_v6 = vmul.f32 -1.442695, %v2505_v47  ;;  %vm1898_vm0 = vcmp.eq.s32.totalorder %v1897_v28, 1 }
 0x82b   :  { %v1945_v12 = vmul.f32 -1.442695, %v2506_v56  ;;  %v1946_v16 = vmul.f32 -1.442695, %v2522_v15 }
 0x82c   :  { %2674 = vpow2.f32 %v1944_v6 }
 0x82d   :  { %2676 = vpow2.f32 %v1945_v12 }
 0x82e   :  { %2678 = vpow2.f32 %v1946_v16 }
 0x82f   :  { %2680 = vtanh.f32 %v2521_v18 }
 0x836   :  { %v2675_v54 = vpop.eup %2674 }
 0x837   :  { %v2677_v57 = vpop.eup %2676  ;;  %v1872_v21 = vadd.f32 1.0, %v2675_v54 }
 0x838   :  { %v1878_v25 = vadd.f32 1.0, %v2677_v57  ;;  %v2679_v62 = vpop.eup %2678 }
 0x839   :  { %2682 = vrcp.f32 %v1872_v21  ;;  %v2681_v8 = vpop.eup %2680  ;;  %v1885_v37 = vadd.f32 1.0, %v2679_v62 }
 0x83a   :  { %2684 = vrcp.f32 %v1878_v25 }
 0x83b   :  { %2686 = vrcp.f32 %v1885_v37 }
 0x843   :  { %v2683_v2 = vpop.eup %2682 }
 0x844   :  { %v2685_v31 = vpop.eup %2684  ;;  %v1889_v32 = vmul.f32 %v2683_v2, %v2681_v8 }
 0x845   :  { %v1888_v26 = vmul.f32 %v2685_v31, %v1708_v13  ;;  %v2687_v22 = vpop.eup %2686 }
 0x847   :  { %v1890_v41 = vadd.f32 %v1889_v32, %v1888_v26 }
 0x849   :  { %2688 = vtanh.f32 %v1890_v41 }
 0x853   :  { %v2689_v42 = vpop.eup %2688 }
 0x854   :  { %v1892_v45 = vmul.f32 %v2689_v42, %v2687_v22 }
 0x856   :  { %v1899_v38 = vsel %vm1898_vm0, %v1892_v45, %v1717_v35 }
 0x857   :  { %1900 = vst [vmem:[%s3369_s5] sm:$0xff] %v1899_v38 }
 0x858   :  { %1905 = vsyncpa [#allocation4], 1 }

</bundles_post_ra>
